<compile_context>
chip_gen: v6e
topology: v6e:2x2x1
jax: 0.10.0
libtpu: 0.0.40
codegen_flags: <defaults>
</compile_context>

<pallas_src>
import numpy as np
import jax
import jax.numpy as jnp
from jax.experimental import pallas as pl
from jax.experimental.pallas import tpu as pltpu

# ---- small BERT-like config (synthetic, not a checkpoint load) ----
VOCAB = 100
VOCAB_PAD = 128          # word-embedding table padded to a full 128-lane tile (rows >= VOCAB are 0)
MAX_POS = 16
HIDDEN = 32
HEADS = 4
HEAD_DIM = HIDDEN // HEADS
INTER = 64
LAYERS = 2
N_CLASSES = 3
LOGIT_PAD = 128          # lane-dense logits slab (sliced back to N_CLASSES outside the kernel)
EPS = 1e-12

# rows of the packed (LAYERS, 9, HIDDEN) per-layer vector slab
_BQ, _BK, _BV, _BO, _G1, _BE1, _BF2, _G2, _BE2 = range(9)


# --------------------------- in-kernel helpers ---------------------------
def _row(mat, i):
    return mat[i:i + 1, :]          # keep 2-D (1, H) for clean broadcasting


def _layernorm(x, gamma, beta):
    mean = jnp.mean(x, axis=-1, keepdims=True)
    var = jnp.mean((x - mean) ** 2, axis=-1, keepdims=True)
    return (x - mean) * jax.lax.rsqrt(var + EPS) * gamma + beta


def _gelu(x):
    # tanh approximation of GELU (EUP-friendly).
    # TODO(synk): HF BERT default is exact erf GELU; tanh approx differs slightly on a checkpoint.
    c = 0.7978845608028654  # sqrt(2/pi)
    return 0.5 * x * (1.0 + jnp.tanh(c * (x + 0.044715 * x * x * x)))


# --------------------------- fused Pallas kernel ---------------------------
def fused_bert_kernel(ids_ref, mask_ref, word_emb_ref, pos_emb_ref, type_emb_ref, emb_ln_ref,
                      head_mask_ref, seg_ref,
                      attn_w_ref, ffn_w1_ref, ffn_w2_ref, vec_h_ref, vec_i_ref,
                      pool_w_ref, pool_b_ref, out_w_ref, out_b_ref,
                      logits_ref):
    B, S = mask_ref.shape
    H = word_emb_ref.shape[1]
    BS = B * S
    M = HEADS * S                                     # mixed (head, key) lane axis

    # ---- in-kernel embedding lookup: one-hot @ table on the MXU (no host-side gather launch) ----
    ids = ids_ref[...]                                                    # (BS, 1) int32
    one_hot = (ids == jax.lax.broadcasted_iota(jnp.int32, (BS, VOCAB_PAD), 1)).astype(jnp.float32)
    x = jnp.dot(one_hot, word_emb_ref[...], preferred_element_type=jnp.float32)   # (BS, H)
    # TODO(synk): token_type_ids hard-coded to type 0 (correct only for all-zero token_type_ids).
    x = (x.reshape(B, S, H)
         + pos_emb_ref[0:S, :][None, :, :]
         + type_emb_ref[0:1, :][None, :, :]).reshape(BS, H)
    ln = emb_ln_ref[...]                                                  # (2, H): gamma, beta
    x = _layernorm(x, _row(ln, 0), _row(ln, 1))

    # ---- per-forward constants, hoisted out of the layer loop (no re-broadcast per layer) ----
    # per-head lane mask hm[h, c] = 1 iff lane c belongs to head h, pre-broadcast for K/V expansion
    hm_b = jnp.broadcast_to(head_mask_ref[...][None, :, None, :], (B, HEADS, S, H))
    seg = seg_ref[...]                                 # (M, M) block-diagonal head-sum matrix
    # additive key bias (0 real / -10000 pad), laid out on the mixed (head-major, key-minor) axis
    neg = (1.0 - mask_ref[...].astype(jnp.float32)) * -10000.0            # (B, S)
    bias_cat = jnp.concatenate([neg] * HEADS, axis=-1)                    # (B, M)
    bias_flat = jnp.broadcast_to(bias_cat[:, None, :], (B, S, M)).reshape(BS, M)

    # ---- encoder layers (static unroll; weights indexed from stacked arrays) ----
    for l in range(LAYERS):
        wq = attn_w_ref[l, 0]                          # (H, H), pre-scaled by 1/sqrt(HEAD_DIM)
        wk = attn_w_ref[l, 1]
        wv = attn_w_ref[l, 2]
        wo = attn_w_ref[l, 3]
        w1 = ffn_w1_ref[l]                             # (H, INTER)
        w2 = ffn_w2_ref[l]                             # (INTER, H)
        vec = vec_h_ref[l]                             # (9, H) biases / LayerNorm params
        bf1 = vec_i_ref[l]                             # (1, INTER)

        q = jnp.dot(x, wq, preferred_element_type=jnp.float32) + _row(vec, _BQ)
        k = jnp.dot(x, wk, preferred_element_type=jnp.float32) + _row(vec, _BK)
        v = jnp.dot(x, wv, preferred_element_type=jnp.float32) + _row(vec, _BV)

        # "heads on lanes": expand K and V to (B, HEADS*S, H) via the per-head lane mask so one
        # batched einsum yields all heads' scores, one softmax normalizes them and one einsum +
        # one K=H matmul produce the already-concatenated attention output.
        k_exp = (k.reshape(B, 1, S, H) * hm_b).reshape(B, M, H)
        v_exp = (v.reshape(B, 1, S, H) * hm_b).reshape(B, M, H)

        sc = jnp.einsum('bqd,bkd->bqk', q.reshape(B, S, H), k_exp,
                        preferred_element_type=jnp.float32)               # (B, S, M)
        sc = sc.reshape(BS, M) + bias_flat
        # row max over ALL heads is a valid softmax stabilizer (any per-row constant works)
        sc = sc - jnp.max(sc, axis=-1, keepdims=True)
        p = jnp.exp(sc)
        # segmented (per-head) denominator via a block-diagonal matmul, already broadcast per lane
        denom = jnp.dot(p, seg, preferred_element_type=jnp.float32)
        p = p * pl.reciprocal(denom, approx=True)      # ~1e-4 rel. error vs exact divide
        ctx = jnp.einsum('bqk,bkd->bqd', p.reshape(B, S, M), v_exp,
                         preferred_element_type=jnp.float32)               # (B, S, H), heads packed
        attn_out = (jnp.dot(ctx.reshape(BS, H), wo, preferred_element_type=jnp.float32)
                    + _row(vec, _BO))

        x1 = _layernorm(x + attn_out, _row(vec, _G1), _row(vec, _BE1))
        ff = _gelu(jnp.dot(x1, w1, preferred_element_type=jnp.float32) + bf1)
        ff = jnp.dot(ff, w2, preferred_element_type=jnp.float32) + _row(vec, _BF2)
        x = _layernorm(x1 + ff, _row(vec, _G2), _row(vec, _BE2))

    # ---- pooler + dropout(p=0.3)==identity at inference + classifier head ----
    # Computed on ALL B*S rows so the store is a dense, sublane-aligned (B*S, 128) slab
    # (no masked store, no in-kernel CLS gather); the wrapper selects rows 0, S, 2S, ...
    pooled = jnp.tanh(jnp.dot(x, pool_w_ref[...], preferred_element_type=jnp.float32)
                      + pool_b_ref[...])
    logits_ref[...] = (jnp.dot(pooled, out_w_ref[...], preferred_element_type=jnp.float32)
                       + out_b_ref[...])                                   # (B*S, LOGIT_PAD)


# --------------------------- parameters ---------------------------
def init_params(key):
    keys = iter(jax.random.split(key, 16))

    def w(shape, scale=0.02):
        return jax.random.normal(next(keys), shape, jnp.float32) * scale

    attn_w = w((LAYERS, 4, HIDDEN, HIDDEN))
    vec_h = jnp.zeros((LAYERS, 9, HIDDEN), jnp.float32)
    vec_h = vec_h.at[:, _G1].set(1.0).at[:, _G2].set(1.0)        # LayerNorm gammas = 1
    # fold the 1/sqrt(head_dim) attention scale into BOTH wq and bq (correct for real checkpoints)
    scale = 1.0 / (HEAD_DIM ** 0.5)
    attn_w = attn_w.at[:, 0].multiply(scale)
    vec_h = vec_h.at[:, _BQ].multiply(scale)

    vec_i = jnp.zeros((LAYERS, 1, INTER), jnp.float32)            # FFN bias bf1 = 0

    word_emb = w((VOCAB, HIDDEN))
    word_emb_pad = jnp.zeros((VOCAB_PAD, HIDDEN), jnp.float32).at[:VOCAB].set(word_emb)

    out_w = w((HIDDEN, N_CLASSES))
    out_w_pad = jnp.zeros((HIDDEN, LOGIT_PAD), jnp.float32).at[:, :N_CLASSES].set(out_w)

    return {
        "word_emb_pad": word_emb_pad,
        "pos_emb": w((MAX_POS, HIDDEN)),
        "type_emb": w((2, HIDDEN)),
        "emb_ln": jnp.concatenate([jnp.ones((1, HIDDEN), jnp.float32),
                                   jnp.zeros((1, HIDDEN), jnp.float32)], axis=0),
        "attn_w": attn_w,
        "ffn_w1": w((LAYERS, HIDDEN, INTER)),
        "ffn_w2": w((LAYERS, INTER, HIDDEN)),
        "vec_h": vec_h,
        "vec_i": vec_i,
        "pool_w": w((HIDDEN, HIDDEN)),
        "pool_b": jnp.zeros((1, HIDDEN), jnp.float32),
        "out_w_pad": out_w_pad,
        "out_b_pad": jnp.zeros((1, LOGIT_PAD), jnp.float32),
    }


# --------------------------- forward (single pallas_call) ---------------------------
@jax.jit
def sentiment_classifier_forward(params, input_ids, attention_mask):
    B, S = input_ids.shape

    # trace-time constants (numpy -> baked into the program; no runtime ops)
    head_mask = jnp.asarray((np.arange(HIDDEN)[None, :] // HEAD_DIM) == np.arange(HEADS)[:, None],
                            jnp.float32)                                   # (HEADS, HIDDEN)
    blk = np.arange(HEADS * S) // S
    seg = jnp.asarray(blk[:, None] == blk[None, :], jnp.float32)           # (HEADS*S, HEADS*S)

    n_inputs = 17
    logits_all = pl.pallas_call(
        fused_bert_kernel,
        out_shape=jax.ShapeDtypeStruct((B * S, LOGIT_PAD), jnp.float32),
        in_specs=[pl.BlockSpec(memory_space=pltpu.MemorySpace.VMEM)] * n_inputs,
        out_specs=pl.BlockSpec(memory_space=pltpu.MemorySpace.VMEM),
    )(input_ids.reshape(B * S, 1).astype(jnp.int32),
      attention_mask.astype(jnp.int32),
      params["word_emb_pad"], params["pos_emb"], params["type_emb"], params["emb_ln"],
      head_mask, seg,
      params["attn_w"], params["ffn_w1"], params["ffn_w2"], params["vec_h"], params["vec_i"],
      params["pool_w"], params["pool_b"], params["out_w_pad"], params["out_b_pad"])

    # rows 0, S, 2S, ... are the [CLS] positions; lanes 0..N_CLASSES-1 are the real logits
    return logits_all[::S, :N_CLASSES]


if __name__ == "__main__":
    key = jax.random.PRNGKey(0)
    k_param, k_ids = jax.random.split(key)

    params = init_params(k_param)

    B, S = 2, 8
    input_ids = jax.random.randint(k_ids, (B, S), 0, VOCAB, dtype=jnp.int32)
    attention_mask = jnp.array([[1, 1, 1, 1, 1, 1, 1, 1],
                                [1, 1, 1, 1, 1, 0, 0, 0]], dtype=jnp.int32)

    logits = sentiment_classifier_forward(params, input_ids, attention_mask)
    jax.block_until_ready(logits)
    assert logits.shape == (B, N_CLASSES)
    assert bool(jnp.all(jnp.isfinite(logits)))
    print("KERNEL_OK")
</pallas_src>

<mosaic_0001>
module attributes {stable_mosaic.version = 11 : i64} {
  func.func @fused_bert_kernel(%arg0: memref<16x1xi32, #tpu.memory_space<vmem>>, %arg1: memref<2x8xi32, #tpu.memory_space<vmem>>, %arg2: memref<128x32xf32, #tpu.memory_space<vmem>>, %arg3: memref<16x32xf32, #tpu.memory_space<vmem>>, %arg4: memref<2x32xf32, #tpu.memory_space<vmem>>, %arg5: memref<2x32xf32, #tpu.memory_space<vmem>>, %arg6: memref<4x32xf32, #tpu.memory_space<vmem>>, %arg7: memref<32x32xf32, #tpu.memory_space<vmem>>, %arg8: memref<2x4x32x32xf32, #tpu.memory_space<vmem>>, %arg9: memref<2x32x64xf32, #tpu.memory_space<vmem>>, %arg10: memref<2x64x32xf32, #tpu.memory_space<vmem>>, %arg11: memref<2x9x32xf32, #tpu.memory_space<vmem>>, %arg12: memref<2x1x64xf32, #tpu.memory_space<vmem>>, %arg13: memref<32x32xf32, #tpu.memory_space<vmem>>, %arg14: memref<1x32xf32, #tpu.memory_space<vmem>>, %arg15: memref<32x128xf32, #tpu.memory_space<vmem>>, %arg16: memref<1x128xf32, #tpu.memory_space<vmem>>, %arg17: memref<16x128xf32, #tpu.memory_space<vmem>>) attributes {dimension_semantics = [], scalar_prefetch = 0 : i64, scratch_operands = 0 : i64, tpu.core_type = #tpu.core_type<tc>} {
    %c0 = arith.constant 0 : index
    %c0_0 = arith.constant 0 : index
    %0 = vector.load %arg0[%c0, %c0_0] : memref<16x1xi32, #tpu.memory_space<vmem>>, vector<16x1xi32>
    %1 = tpu.iota {dimensions = array<i32: 1>} : vector<16x128xi32>
    %2 = vector.broadcast %0 : vector<16x1xi32> to vector<16x128xi32>
    %3 = arith.cmpi eq, %2, %1 : vector<16x128xi32>
    %4 = arith.extui %3 : vector<16x128xi1> to vector<16x128xi32>
    %5 = arith.sitofp %4 : vector<16x128xi32> to vector<16x128xf32>
    %c0_1 = arith.constant 0 : index
    %c0_2 = arith.constant 0 : index
    %6 = vector.load %arg2[%c0_1, %c0_2] : memref<128x32xf32, #tpu.memory_space<vmem>>, vector<128x32xf32>
    %cst = arith.constant dense<0.000000e+00> : vector<16x32xf32>
    %7 = tpu.matmul %5, %6, %cst {dimension_numbers = #tpu.dot_dimension_numbers<[1], [0], [0], [1], [0, 0, 1, 1], [], []>} : vector<16x128xf32>, vector<128x32xf32>, vector<16x32xf32> -> vector<16x32xf32>
    %8 = vector.shape_cast %7 : vector<16x32xf32> to vector<2x8x32xf32>
    %c0_3 = arith.constant 0 : index
    %c0_4 = arith.constant 0 : index
    %9 = vector.load %arg3[%c0_3, %c0_4] : memref<16x32xf32, #tpu.memory_space<vmem>>, vector<8x32xf32>
    %10 = vector.shape_cast %9 : vector<8x32xf32> to vector<1x8x32xf32>
    %11 = vector.broadcast %10 : vector<1x8x32xf32> to vector<2x8x32xf32>
    %12 = arith.addf %8, %11 : vector<2x8x32xf32>
    %c0_5 = arith.constant 0 : index
    %c0_6 = arith.constant 0 : index
    %13 = vector.load %arg4[%c0_5, %c0_6] : memref<2x32xf32, #tpu.memory_space<vmem>>, vector<1x32xf32>
    %14 = vector.shape_cast %13 : vector<1x32xf32> to vector<1x1x32xf32>
    %15 = vector.broadcast %14 : vector<1x1x32xf32> to vector<2x8x32xf32>
    %16 = arith.addf %12, %15 : vector<2x8x32xf32>
    %17 = vector.shape_cast %16 : vector<2x8x32xf32> to vector<16x32xf32>
    %c0_7 = arith.constant 0 : index
    %c0_8 = arith.constant 0 : index
    %18 = vector.load %arg5[%c0_7, %c0_8] : memref<2x32xf32, #tpu.memory_space<vmem>>, vector<2x32xf32>
    %19 = vector.extract_strided_slice %18 {offsets = [0, 0], sizes = [1, 32], strides = [1, 1]} : vector<2x32xf32> to vector<1x32xf32>
    %20 = vector.extract_strided_slice %18 {offsets = [1, 0], sizes = [1, 32], strides = [1, 1]} : vector<2x32xf32> to vector<1x32xf32>
    %cst_9 = arith.constant dense<0.000000e+00> : vector<16xf32>
    %21 = vector.multi_reduction <add>, %17, %cst_9 [1] : vector<16x32xf32> to vector<16xf32>
    %22 = vector.shape_cast %21 : vector<16xf32> to vector<16x1xf32>
    %cst_10 = arith.constant 3.200000e+01 : f32
    %23 = vector.broadcast %cst_10 : f32 to vector<16x1xf32>
    %24 = arith.divf %22, %23 : vector<16x1xf32>
    %25 = vector.broadcast %24 : vector<16x1xf32> to vector<16x32xf32>
    %26 = arith.subf %17, %25 : vector<16x32xf32>
    %27 = arith.mulf %26, %26 : vector<16x32xf32>
    %cst_11 = arith.constant dense<0.000000e+00> : vector<16xf32>
    %28 = vector.multi_reduction <add>, %27, %cst_11 [1] : vector<16x32xf32> to vector<16xf32>
    %29 = vector.shape_cast %28 : vector<16xf32> to vector<16x1xf32>
    %cst_12 = arith.constant 3.200000e+01 : f32
    %30 = vector.broadcast %cst_12 : f32 to vector<16x1xf32>
    %31 = arith.divf %29, %30 : vector<16x1xf32>
    %32 = vector.broadcast %24 : vector<16x1xf32> to vector<16x32xf32>
    %33 = arith.subf %17, %32 : vector<16x32xf32>
    %cst_13 = arith.constant 9.99999996E-13 : f32
    %34 = vector.broadcast %cst_13 : f32 to vector<16x1xf32>
    %35 = arith.addf %31, %34 : vector<16x1xf32>
    %36 = math.rsqrt %35 : vector<16x1xf32>
    %37 = vector.broadcast %36 : vector<16x1xf32> to vector<16x32xf32>
    %38 = arith.mulf %33, %37 : vector<16x32xf32>
    %39 = vector.broadcast %19 : vector<1x32xf32> to vector<16x32xf32>
    %40 = arith.mulf %38, %39 : vector<16x32xf32>
    %41 = vector.broadcast %20 : vector<1x32xf32> to vector<16x32xf32>
    %42 = arith.addf %40, %41 : vector<16x32xf32>
    %c0_14 = arith.constant 0 : index
    %c0_15 = arith.constant 0 : index
    %43 = vector.load %arg6[%c0_14, %c0_15] : memref<4x32xf32, #tpu.memory_space<vmem>>, vector<4x32xf32>
    %44 = vector.shape_cast %43 : vector<4x32xf32> to vector<1x4x1x32xf32>
    %45 = vector.shape_cast %44 : vector<1x4x1x32xf32> to vector<1x4x1x32xf32>
    %46 = vector.broadcast %45 : vector<1x4x1x32xf32> to vector<2x4x8x32xf32>
    %c0_16 = arith.constant 0 : index
    %c0_17 = arith.constant 0 : index
    %47 = vector.load %arg7[%c0_16, %c0_17] : memref<32x32xf32, #tpu.memory_space<vmem>>, vector<32x32xf32>
    %c0_18 = arith.constant 0 : index
    %c0_19 = arith.constant 0 : index
    %48 = vector.load %arg1[%c0_18, %c0_19] : memref<2x8xi32, #tpu.memory_space<vmem>>, vector<2x8xi32>
    %49 = arith.sitofp %48 : vector<2x8xi32> to vector<2x8xf32>
    %cst_20 = arith.constant 1.000000e+00 : f32
    %50 = vector.broadcast %cst_20 : f32 to vector<2x8xf32>
    %51 = arith.subf %50, %49 : vector<2x8xf32>
    %cst_21 = arith.constant -1.000000e+04 : f32
    %52 = vector.broadcast %cst_21 : f32 to vector<2x8xf32>
    %53 = arith.mulf %51, %52 : vector<2x8xf32>
    %54 = tpu.concatenate %53, %53, %53, %53 in 1 : vector<2x8xf32>, vector<2x8xf32>, vector<2x8xf32>, vector<2x8xf32> -> vector<2x32xf32>
    %55 = vector.shape_cast %54 : vector<2x32xf32> to vector<2x1x32xf32>
    %56 = vector.shape_cast %55 : vector<2x1x32xf32> to vector<2x1x32xf32>
    %57 = vector.broadcast %56 : vector<2x1x32xf32> to vector<2x8x32xf32>
    %58 = vector.shape_cast %57 : vector<2x8x32xf32> to vector<16x32xf32>
    %c0_22 = arith.constant 0 : index
    %c0_23 = arith.constant 0 : index
    %c0_24 = arith.constant 0 : index
    %c0_25 = arith.constant 0 : index
    %59 = vector.load %arg8[%c0_22, %c0_23, %c0_24, %c0_25] : memref<2x4x32x32xf32, #tpu.memory_space<vmem>>, vector<1x1x32x32xf32>
    %60 = vector.shape_cast %59 : vector<1x1x32x32xf32> to vector<32x32xf32>
    %c0_26 = arith.constant 0 : index
    %c1 = arith.constant 1 : index
    %c0_27 = arith.constant 0 : index
    %c0_28 = arith.constant 0 : index
    %61 = vector.load %arg8[%c0_26, %c1, %c0_27, %c0_28] : memref<2x4x32x32xf32, #tpu.memory_space<vmem>>, vector<1x1x32x32xf32>
    %62 = vector.shape_cast %61 : vector<1x1x32x32xf32> to vector<32x32xf32>
    %c0_29 = arith.constant 0 : index
    %c2 = arith.constant 2 : index
    %c0_30 = arith.constant 0 : index
    %c0_31 = arith.constant 0 : index
    %63 = vector.load %arg8[%c0_29, %c2, %c0_30, %c0_31] : memref<2x4x32x32xf32, #tpu.memory_space<vmem>>, vector<1x1x32x32xf32>
    %64 = vector.shape_cast %63 : vector<1x1x32x32xf32> to vector<32x32xf32>
    %c0_32 = arith.constant 0 : index
    %c3 = arith.constant 3 : index
    %c0_33 = arith.constant 0 : index
    %c0_34 = arith.constant 0 : index
    %65 = vector.load %arg8[%c0_32, %c3, %c0_33, %c0_34] : memref<2x4x32x32xf32, #tpu.memory_space<vmem>>, vector<1x1x32x32xf32>
    %66 = vector.shape_cast %65 : vector<1x1x32x32xf32> to vector<32x32xf32>
    %c0_35 = arith.constant 0 : index
    %c0_36 = arith.constant 0 : index
    %c0_37 = arith.constant 0 : index
    %67 = vector.load %arg9[%c0_35, %c0_36, %c0_37] : memref<2x32x64xf32, #tpu.memory_space<vmem>>, vector<1x32x64xf32>
    %68 = vector.shape_cast %67 : vector<1x32x64xf32> to vector<32x64xf32>
    %c0_38 = arith.constant 0 : index
    %c0_39 = arith.constant 0 : index
    %c0_40 = arith.constant 0 : index
    %69 = vector.load %arg10[%c0_38, %c0_39, %c0_40] : memref<2x64x32xf32, #tpu.memory_space<vmem>>, vector<1x64x32xf32>
    %70 = vector.shape_cast %69 : vector<1x64x32xf32> to vector<64x32xf32>
    %c0_41 = arith.constant 0 : index
    %c0_42 = arith.constant 0 : index
    %c0_43 = arith.constant 0 : index
    %71 = vector.load %arg11[%c0_41, %c0_42, %c0_43] : memref<2x9x32xf32, #tpu.memory_space<vmem>>, vector<1x9x32xf32>
    %72 = vector.shape_cast %71 : vector<1x9x32xf32> to vector<9x32xf32>
    %c0_44 = arith.constant 0 : index
    %c0_45 = arith.constant 0 : index
    %c0_46 = arith.constant 0 : index
    %73 = vector.load %arg12[%c0_44, %c0_45, %c0_46] : memref<2x1x64xf32, #tpu.memory_space<vmem>>, vector<1x1x64xf32>
    %74 = vector.shape_cast %73 : vector<1x1x64xf32> to vector<1x64xf32>
    %cst_47 = arith.constant dense<0.000000e+00> : vector<16x32xf32>
    %75 = tpu.matmul %42, %60, %cst_47 {dimension_numbers = #tpu.dot_dimension_numbers<[1], [0], [0], [1], [0, 0, 1, 1], [], []>} : vector<16x32xf32>, vector<32x32xf32>, vector<16x32xf32> -> vector<16x32xf32>
    %76 = vector.extract_strided_slice %72 {offsets = [0, 0], sizes = [1, 32], strides = [1, 1]} : vector<9x32xf32> to vector<1x32xf32>
    %77 = vector.broadcast %76 : vector<1x32xf32> to vector<16x32xf32>
    %78 = arith.addf %75, %77 : vector<16x32xf32>
    %cst_48 = arith.constant dense<0.000000e+00> : vector<16x32xf32>
    %79 = tpu.matmul %42, %62, %cst_48 {dimension_numbers = #tpu.dot_dimension_numbers<[1], [0], [0], [1], [0, 0, 1, 1], [], []>} : vector<16x32xf32>, vector<32x32xf32>, vector<16x32xf32> -> vector<16x32xf32>
    %80 = vector.extract_strided_slice %72 {offsets = [1, 0], sizes = [1, 32], strides = [1, 1]} : vector<9x32xf32> to vector<1x32xf32>
    %81 = vector.broadcast %80 : vector<1x32xf32> to vector<16x32xf32>
    %82 = arith.addf %79, %81 : vector<16x32xf32>
    %cst_49 = arith.constant dense<0.000000e+00> : vector<16x32xf32>
    %83 = tpu.matmul %42, %64, %cst_49 {dimension_numbers = #tpu.dot_dimension_numbers<[1], [0], [0], [1], [0, 0, 1, 1], [], []>} : vector<16x32xf32>, vector<32x32xf32>, vector<16x32xf32> -> vector<16x32xf32>
    %84 = vector.extract_strided_slice %72 {offsets = [2, 0], sizes = [1, 32], strides = [1, 1]} : vector<9x32xf32> to vector<1x32xf32>
    %85 = vector.broadcast %84 : vector<1x32xf32> to vector<16x32xf32>
    %86 = arith.addf %83, %85 : vector<16x32xf32>
    %87 = vector.shape_cast %82 : vector<16x32xf32> to vector<2x1x8x32xf32>
    %88 = vector.broadcast %87 : vector<2x1x8x32xf32> to vector<2x4x8x32xf32>
    %89 = arith.mulf %88, %46 : vector<2x4x8x32xf32>
    %90 = vector.shape_cast %89 : vector<2x4x8x32xf32> to vector<2x32x32xf32>
    %91 = vector.shape_cast %86 : vector<16x32xf32> to vector<2x1x8x32xf32>
    %92 = vector.broadcast %91 : vector<2x1x8x32xf32> to vector<2x4x8x32xf32>
    %93 = arith.mulf %92, %46 : vector<2x4x8x32xf32>
    %94 = vector.shape_cast %93 : vector<2x4x8x32xf32> to vector<2x32x32xf32>
    %95 = vector.shape_cast %78 : vector<16x32xf32> to vector<2x8x32xf32>
    "tpu.trace_start"() <{level = 10 : i32, message = "bqd,bkd->bqk"}> : () -> ()
    %cst_50 = arith.constant dense<0.000000e+00> : vector<2x8x32xf32>
    %96 = tpu.matmul %95, %90, %cst_50 {dimension_numbers = #tpu.dot_dimension_numbers<[2], [2], [1], [1], [0, 0, 0, 1, 1, 1], [0], [0]>} : vector<2x8x32xf32>, vector<2x32x32xf32>, vector<2x8x32xf32> -> vector<2x8x32xf32>
    "tpu.trace_stop"() : () -> ()
    %97 = vector.shape_cast %96 : vector<2x8x32xf32> to vector<16x32xf32>
    %98 = arith.addf %97, %58 : vector<16x32xf32>
    %cst_51 = arith.constant dense<0xFF800000> : vector<16xf32>
    %99 = vector.multi_reduction <maximumf>, %98, %cst_51 [1] : vector<16x32xf32> to vector<16xf32>
    %100 = vector.shape_cast %99 : vector<16xf32> to vector<16x1xf32>
    %101 = vector.broadcast %100 : vector<16x1xf32> to vector<16x32xf32>
    %102 = arith.subf %98, %101 : vector<16x32xf32>
    %103 = math.exp %102 : vector<16x32xf32>
    %cst_52 = arith.constant dense<0.000000e+00> : vector<16x32xf32>
    %104 = tpu.matmul %103, %47, %cst_52 {dimension_numbers = #tpu.dot_dimension_numbers<[1], [0], [0], [1], [0, 0, 1, 1], [], []>} : vector<16x32xf32>, vector<32x32xf32>, vector<16x32xf32> -> vector<16x32xf32>
    %105 = tpu.reciprocal %104 {approx = true} : vector<16x32xf32> -> vector<16x32xf32>
    %106 = arith.mulf %103, %105 : vector<16x32xf32>
    %107 = vector.shape_cast %106 : vector<16x32xf32> to vector<2x8x32xf32>
    "tpu.trace_start"() <{level = 10 : i32, message = "bqk,bkd->bqd"}> : () -> ()
    %cst_53 = arith.constant dense<0.000000e+00> : vector<2x8x32xf32>
    %108 = tpu.matmul %107, %94, %cst_53 {dimension_numbers = #tpu.dot_dimension_numbers<[2], [1], [1], [2], [0, 0, 0, 1, 1, 2], [0], [0]>} : vector<2x8x32xf32>, vector<2x32x32xf32>, vector<2x8x32xf32> -> vector<2x8x32xf32>
    "tpu.trace_stop"() : () -> ()
    %109 = vector.shape_cast %108 : vector<2x8x32xf32> to vector<16x32xf32>
    %cst_54 = arith.constant dense<0.000000e+00> : vector<16x32xf32>
    %110 = tpu.matmul %109, %66, %cst_54 {dimension_numbers = #tpu.dot_dimension_numbers<[1], [0], [0], [1], [0, 0, 1, 1], [], []>} : vector<16x32xf32>, vector<32x32xf32>, vector<16x32xf32> -> vector<16x32xf32>
    %111 = vector.extract_strided_slice %72 {offsets = [3, 0], sizes = [1, 32], strides = [1, 1]} : vector<9x32xf32> to vector<1x32xf32>
    %112 = vector.broadcast %111 : vector<1x32xf32> to vector<16x32xf32>
    %113 = arith.addf %110, %112 : vector<16x32xf32>
    %114 = arith.addf %42, %113 : vector<16x32xf32>
    %115 = vector.extract_strided_slice %72 {offsets = [4, 0], sizes = [1, 32], strides = [1, 1]} : vector<9x32xf32> to vector<1x32xf32>
    %116 = vector.extract_strided_slice %72 {offsets = [5, 0], sizes = [1, 32], strides = [1, 1]} : vector<9x32xf32> to vector<1x32xf32>
    %cst_55 = arith.constant dense<0.000000e+00> : vector<16xf32>
    %117 = vector.multi_reduction <add>, %114, %cst_55 [1] : vector<16x32xf32> to vector<16xf32>
    %118 = vector.shape_cast %117 : vector<16xf32> to vector<16x1xf32>
    %cst_56 = arith.constant 3.200000e+01 : f32
    %119 = vector.broadcast %cst_56 : f32 to vector<16x1xf32>
    %120 = arith.divf %118, %119 : vector<16x1xf32>
    %121 = vector.broadcast %120 : vector<16x1xf32> to vector<16x32xf32>
    %122 = arith.subf %114, %121 : vector<16x32xf32>
    %123 = arith.mulf %122, %122 : vector<16x32xf32>
    %cst_57 = arith.constant dense<0.000000e+00> : vector<16xf32>
    %124 = vector.multi_reduction <add>, %123, %cst_57 [1] : vector<16x32xf32> to vector<16xf32>
    %125 = vector.shape_cast %124 : vector<16xf32> to vector<16x1xf32>
    %cst_58 = arith.constant 3.200000e+01 : f32
    %126 = vector.broadcast %cst_58 : f32 to vector<16x1xf32>
    %127 = arith.divf %125, %126 : vector<16x1xf32>
    %128 = vector.broadcast %120 : vector<16x1xf32> to vector<16x32xf32>
    %129 = arith.subf %114, %128 : vector<16x32xf32>
    %cst_59 = arith.constant 9.99999996E-13 : f32
    %130 = vector.broadcast %cst_59 : f32 to vector<16x1xf32>
    %131 = arith.addf %127, %130 : vector<16x1xf32>
    %132 = math.rsqrt %131 : vector<16x1xf32>
    %133 = vector.broadcast %132 : vector<16x1xf32> to vector<16x32xf32>
    %134 = arith.mulf %129, %133 : vector<16x32xf32>
    %135 = vector.broadcast %115 : vector<1x32xf32> to vector<16x32xf32>
    %136 = arith.mulf %134, %135 : vector<16x32xf32>
    %137 = vector.broadcast %116 : vector<1x32xf32> to vector<16x32xf32>
    %138 = arith.addf %136, %137 : vector<16x32xf32>
    %cst_60 = arith.constant dense<0.000000e+00> : vector<16x64xf32>
    %139 = tpu.matmul %138, %68, %cst_60 {dimension_numbers = #tpu.dot_dimension_numbers<[1], [0], [0], [1], [0, 0, 1, 1], [], []>} : vector<16x32xf32>, vector<32x64xf32>, vector<16x64xf32> -> vector<16x64xf32>
    %140 = vector.broadcast %74 : vector<1x64xf32> to vector<16x64xf32>
    %141 = arith.addf %139, %140 : vector<16x64xf32>
    %cst_61 = arith.constant 5.000000e-01 : f32
    %142 = vector.broadcast %cst_61 : f32 to vector<16x64xf32>
    %143 = arith.mulf %142, %141 : vector<16x64xf32>
    %cst_62 = arith.constant 4.471500e-02 : f32
    %144 = vector.broadcast %cst_62 : f32 to vector<16x64xf32>
    %145 = arith.mulf %144, %141 : vector<16x64xf32>
    %146 = arith.mulf %145, %141 : vector<16x64xf32>
    %147 = arith.mulf %146, %141 : vector<16x64xf32>
    %148 = arith.addf %141, %147 : vector<16x64xf32>
    %cst_63 = arith.constant 0.797884583 : f32
    %149 = vector.broadcast %cst_63 : f32 to vector<16x64xf32>
    %150 = arith.mulf %149, %148 : vector<16x64xf32>
    %151 = math.tanh %150 : vector<16x64xf32>
    %cst_64 = arith.constant 1.000000e+00 : f32
    %152 = vector.broadcast %cst_64 : f32 to vector<16x64xf32>
    %153 = arith.addf %152, %151 : vector<16x64xf32>
    %154 = arith.mulf %143, %153 : vector<16x64xf32>
    %cst_65 = arith.constant dense<0.000000e+00> : vector<16x32xf32>
    %155 = tpu.matmul %154, %70, %cst_65 {dimension_numbers = #tpu.dot_dimension_numbers<[1], [0], [0], [1], [0, 0, 1, 1], [], []>} : vector<16x64xf32>, vector<64x32xf32>, vector<16x32xf32> -> vector<16x32xf32>
    %156 = vector.extract_strided_slice %72 {offsets = [6, 0], sizes = [1, 32], strides = [1, 1]} : vector<9x32xf32> to vector<1x32xf32>
    %157 = vector.broadcast %156 : vector<1x32xf32> to vector<16x32xf32>
    %158 = arith.addf %155, %157 : vector<16x32xf32>
    %159 = arith.addf %138, %158 : vector<16x32xf32>
    %160 = vector.extract_strided_slice %72 {offsets = [7, 0], sizes = [1, 32], strides = [1, 1]} : vector<9x32xf32> to vector<1x32xf32>
    %161 = vector.extract_strided_slice %72 {offsets = [8, 0], sizes = [1, 32], strides = [1, 1]} : vector<9x32xf32> to vector<1x32xf32>
    %cst_66 = arith.constant dense<0.000000e+00> : vector<16xf32>
    %162 = vector.multi_reduction <add>, %159, %cst_66 [1] : vector<16x32xf32> to vector<16xf32>
    %163 = vector.shape_cast %162 : vector<16xf32> to vector<16x1xf32>
    %cst_67 = arith.constant 3.200000e+01 : f32
    %164 = vector.broadcast %cst_67 : f32 to vector<16x1xf32>
    %165 = arith.divf %163, %164 : vector<16x1xf32>
    %166 = vector.broadcast %165 : vector<16x1xf32> to vector<16x32xf32>
    %167 = arith.subf %159, %166 : vector<16x32xf32>
    %168 = arith.mulf %167, %167 : vector<16x32xf32>
    %cst_68 = arith.constant dense<0.000000e+00> : vector<16xf32>
    %169 = vector.multi_reduction <add>, %168, %cst_68 [1] : vector<16x32xf32> to vector<16xf32>
    %170 = vector.shape_cast %169 : vector<16xf32> to vector<16x1xf32>
    %cst_69 = arith.constant 3.200000e+01 : f32
    %171 = vector.broadcast %cst_69 : f32 to vector<16x1xf32>
    %172 = arith.divf %170, %171 : vector<16x1xf32>
    %173 = vector.broadcast %165 : vector<16x1xf32> to vector<16x32xf32>
    %174 = arith.subf %159, %173 : vector<16x32xf32>
    %cst_70 = arith.constant 9.99999996E-13 : f32
    %175 = vector.broadcast %cst_70 : f32 to vector<16x1xf32>
    %176 = arith.addf %172, %175 : vector<16x1xf32>
    %177 = math.rsqrt %176 : vector<16x1xf32>
    %178 = vector.broadcast %177 : vector<16x1xf32> to vector<16x32xf32>
    %179 = arith.mulf %174, %178 : vector<16x32xf32>
    %180 = vector.broadcast %160 : vector<1x32xf32> to vector<16x32xf32>
    %181 = arith.mulf %179, %180 : vector<16x32xf32>
    %182 = vector.broadcast %161 : vector<1x32xf32> to vector<16x32xf32>
    %183 = arith.addf %181, %182 : vector<16x32xf32>
    %c1_71 = arith.constant 1 : index
    %c0_72 = arith.constant 0 : index
    %c0_73 = arith.constant 0 : index
    %c0_74 = arith.constant 0 : index
    %184 = vector.load %arg8[%c1_71, %c0_72, %c0_73, %c0_74] : memref<2x4x32x32xf32, #tpu.memory_space<vmem>>, vector<1x1x32x32xf32>
    %185 = vector.shape_cast %184 : vector<1x1x32x32xf32> to vector<32x32xf32>
    %c1_75 = arith.constant 1 : index
    %c1_76 = arith.constant 1 : index
    %c0_77 = arith.constant 0 : index
    %c0_78 = arith.constant 0 : index
    %186 = vector.load %arg8[%c1_75, %c1_76, %c0_77, %c0_78] : memref<2x4x32x32xf32, #tpu.memory_space<vmem>>, vector<1x1x32x32xf32>
    %187 = vector.shape_cast %186 : vector<1x1x32x32xf32> to vector<32x32xf32>
    %c1_79 = arith.constant 1 : index
    %c2_80 = arith.constant 2 : index
    %c0_81 = arith.constant 0 : index
    %c0_82 = arith.constant 0 : index
    %188 = vector.load %arg8[%c1_79, %c2_80, %c0_81, %c0_82] : memref<2x4x32x32xf32, #tpu.memory_space<vmem>>, vector<1x1x32x32xf32>
    %189 = vector.shape_cast %188 : vector<1x1x32x32xf32> to vector<32x32xf32>
    %c1_83 = arith.constant 1 : index
    %c3_84 = arith.constant 3 : index
    %c0_85 = arith.constant 0 : index
    %c0_86 = arith.constant 0 : index
    %190 = vector.load %arg8[%c1_83, %c3_84, %c0_85, %c0_86] : memref<2x4x32x32xf32, #tpu.memory_space<vmem>>, vector<1x1x32x32xf32>
    %191 = vector.shape_cast %190 : vector<1x1x32x32xf32> to vector<32x32xf32>
    %c1_87 = arith.constant 1 : index
    %c0_88 = arith.constant 0 : index
    %c0_89 = arith.constant 0 : index
    %192 = vector.load %arg9[%c1_87, %c0_88, %c0_89] : memref<2x32x64xf32, #tpu.memory_space<vmem>>, vector<1x32x64xf32>
    %193 = vector.shape_cast %192 : vector<1x32x64xf32> to vector<32x64xf32>
    %c1_90 = arith.constant 1 : index
    %c0_91 = arith.constant 0 : index
    %c0_92 = arith.constant 0 : index
    %194 = vector.load %arg10[%c1_90, %c0_91, %c0_92] : memref<2x64x32xf32, #tpu.memory_space<vmem>>, vector<1x64x32xf32>
    %195 = vector.shape_cast %194 : vector<1x64x32xf32> to vector<64x32xf32>
    %c1_93 = arith.constant 1 : index
    %c0_94 = arith.constant 0 : index
    %c0_95 = arith.constant 0 : index
    %196 = vector.load %arg11[%c1_93, %c0_94, %c0_95] : memref<2x9x32xf32, #tpu.memory_space<vmem>>, vector<1x9x32xf32>
    %197 = vector.shape_cast %196 : vector<1x9x32xf32> to vector<9x32xf32>
    %c1_96 = arith.constant 1 : index
    %c0_97 = arith.constant 0 : index
    %c0_98 = arith.constant 0 : index
    %198 = vector.load %arg12[%c1_96, %c0_97, %c0_98] : memref<2x1x64xf32, #tpu.memory_space<vmem>>, vector<1x1x64xf32>
    %199 = vector.shape_cast %198 : vector<1x1x64xf32> to vector<1x64xf32>
    %cst_99 = arith.constant dense<0.000000e+00> : vector<16x32xf32>
    %200 = tpu.matmul %183, %185, %cst_99 {dimension_numbers = #tpu.dot_dimension_numbers<[1], [0], [0], [1], [0, 0, 1, 1], [], []>} : vector<16x32xf32>, vector<32x32xf32>, vector<16x32xf32> -> vector<16x32xf32>
    %201 = vector.extract_strided_slice %197 {offsets = [0, 0], sizes = [1, 32], strides = [1, 1]} : vector<9x32xf32> to vector<1x32xf32>
    %202 = vector.broadcast %201 : vector<1x32xf32> to vector<16x32xf32>
    %203 = arith.addf %200, %202 : vector<16x32xf32>
    %cst_100 = arith.constant dense<0.000000e+00> : vector<16x32xf32>
    %204 = tpu.matmul %183, %187, %cst_100 {dimension_numbers = #tpu.dot_dimension_numbers<[1], [0], [0], [1], [0, 0, 1, 1], [], []>} : vector<16x32xf32>, vector<32x32xf32>, vector<16x32xf32> -> vector<16x32xf32>
    %205 = vector.extract_strided_slice %197 {offsets = [1, 0], sizes = [1, 32], strides = [1, 1]} : vector<9x32xf32> to vector<1x32xf32>
    %206 = vector.broadcast %205 : vector<1x32xf32> to vector<16x32xf32>
    %207 = arith.addf %204, %206 : vector<16x32xf32>
    %cst_101 = arith.constant dense<0.000000e+00> : vector<16x32xf32>
    %208 = tpu.matmul %183, %189, %cst_101 {dimension_numbers = #tpu.dot_dimension_numbers<[1], [0], [0], [1], [0, 0, 1, 1], [], []>} : vector<16x32xf32>, vector<32x32xf32>, vector<16x32xf32> -> vector<16x32xf32>
    %209 = vector.extract_strided_slice %197 {offsets = [2, 0], sizes = [1, 32], strides = [1, 1]} : vector<9x32xf32> to vector<1x32xf32>
    %210 = vector.broadcast %209 : vector<1x32xf32> to vector<16x32xf32>
    %211 = arith.addf %208, %210 : vector<16x32xf32>
    %212 = vector.shape_cast %207 : vector<16x32xf32> to vector<2x1x8x32xf32>
    %213 = vector.broadcast %212 : vector<2x1x8x32xf32> to vector<2x4x8x32xf32>
    %214 = arith.mulf %213, %46 : vector<2x4x8x32xf32>
    %215 = vector.shape_cast %214 : vector<2x4x8x32xf32> to vector<2x32x32xf32>
    %216 = vector.shape_cast %211 : vector<16x32xf32> to vector<2x1x8x32xf32>
    %217 = vector.broadcast %216 : vector<2x1x8x32xf32> to vector<2x4x8x32xf32>
    %218 = arith.mulf %217, %46 : vector<2x4x8x32xf32>
    %219 = vector.shape_cast %218 : vector<2x4x8x32xf32> to vector<2x32x32xf32>
    %220 = vector.shape_cast %203 : vector<16x32xf32> to vector<2x8x32xf32>
    "tpu.trace_start"() <{level = 10 : i32, message = "bqd,bkd->bqk"}> : () -> ()
    %cst_102 = arith.constant dense<0.000000e+00> : vector<2x8x32xf32>
    %221 = tpu.matmul %220, %215, %cst_102 {dimension_numbers = #tpu.dot_dimension_numbers<[2], [2], [1], [1], [0, 0, 0, 1, 1, 1], [0], [0]>} : vector<2x8x32xf32>, vector<2x32x32xf32>, vector<2x8x32xf32> -> vector<2x8x32xf32>
    "tpu.trace_stop"() : () -> ()
    %222 = vector.shape_cast %221 : vector<2x8x32xf32> to vector<16x32xf32>
    %223 = arith.addf %222, %58 : vector<16x32xf32>
    %cst_103 = arith.constant dense<0xFF800000> : vector<16xf32>
    %224 = vector.multi_reduction <maximumf>, %223, %cst_103 [1] : vector<16x32xf32> to vector<16xf32>
    %225 = vector.shape_cast %224 : vector<16xf32> to vector<16x1xf32>
    %226 = vector.broadcast %225 : vector<16x1xf32> to vector<16x32xf32>
    %227 = arith.subf %223, %226 : vector<16x32xf32>
    %228 = math.exp %227 : vector<16x32xf32>
    %cst_104 = arith.constant dense<0.000000e+00> : vector<16x32xf32>
    %229 = tpu.matmul %228, %47, %cst_104 {dimension_numbers = #tpu.dot_dimension_numbers<[1], [0], [0], [1], [0, 0, 1, 1], [], []>} : vector<16x32xf32>, vector<32x32xf32>, vector<16x32xf32> -> vector<16x32xf32>
    %230 = tpu.reciprocal %229 {approx = true} : vector<16x32xf32> -> vector<16x32xf32>
    %231 = arith.mulf %228, %230 : vector<16x32xf32>
    %232 = vector.shape_cast %231 : vector<16x32xf32> to vector<2x8x32xf32>
    "tpu.trace_start"() <{level = 10 : i32, message = "bqk,bkd->bqd"}> : () -> ()
    %cst_105 = arith.constant dense<0.000000e+00> : vector<2x8x32xf32>
    %233 = tpu.matmul %232, %219, %cst_105 {dimension_numbers = #tpu.dot_dimension_numbers<[2], [1], [1], [2], [0, 0, 0, 1, 1, 2], [0], [0]>} : vector<2x8x32xf32>, vector<2x32x32xf32>, vector<2x8x32xf32> -> vector<2x8x32xf32>
    "tpu.trace_stop"() : () -> ()
    %234 = vector.shape_cast %233 : vector<2x8x32xf32> to vector<16x32xf32>
    %cst_106 = arith.constant dense<0.000000e+00> : vector<16x32xf32>
    %235 = tpu.matmul %234, %191, %cst_106 {dimension_numbers = #tpu.dot_dimension_numbers<[1], [0], [0], [1], [0, 0, 1, 1], [], []>} : vector<16x32xf32>, vector<32x32xf32>, vector<16x32xf32> -> vector<16x32xf32>
    %236 = vector.extract_strided_slice %197 {offsets = [3, 0], sizes = [1, 32], strides = [1, 1]} : vector<9x32xf32> to vector<1x32xf32>
    %237 = vector.broadcast %236 : vector<1x32xf32> to vector<16x32xf32>
    %238 = arith.addf %235, %237 : vector<16x32xf32>
    %239 = arith.addf %183, %238 : vector<16x32xf32>
    %240 = vector.extract_strided_slice %197 {offsets = [4, 0], sizes = [1, 32], strides = [1, 1]} : vector<9x32xf32> to vector<1x32xf32>
    %241 = vector.extract_strided_slice %197 {offsets = [5, 0], sizes = [1, 32], strides = [1, 1]} : vector<9x32xf32> to vector<1x32xf32>
    %cst_107 = arith.constant dense<0.000000e+00> : vector<16xf32>
    %242 = vector.multi_reduction <add>, %239, %cst_107 [1] : vector<16x32xf32> to vector<16xf32>
    %243 = vector.shape_cast %242 : vector<16xf32> to vector<16x1xf32>
    %cst_108 = arith.constant 3.200000e+01 : f32
    %244 = vector.broadcast %cst_108 : f32 to vector<16x1xf32>
    %245 = arith.divf %243, %244 : vector<16x1xf32>
    %246 = vector.broadcast %245 : vector<16x1xf32> to vector<16x32xf32>
    %247 = arith.subf %239, %246 : vector<16x32xf32>
    %248 = arith.mulf %247, %247 : vector<16x32xf32>
    %cst_109 = arith.constant dense<0.000000e+00> : vector<16xf32>
    %249 = vector.multi_reduction <add>, %248, %cst_109 [1] : vector<16x32xf32> to vector<16xf32>
    %250 = vector.shape_cast %249 : vector<16xf32> to vector<16x1xf32>
    %cst_110 = arith.constant 3.200000e+01 : f32
    %251 = vector.broadcast %cst_110 : f32 to vector<16x1xf32>
    %252 = arith.divf %250, %251 : vector<16x1xf32>
    %253 = vector.broadcast %245 : vector<16x1xf32> to vector<16x32xf32>
    %254 = arith.subf %239, %253 : vector<16x32xf32>
    %cst_111 = arith.constant 9.99999996E-13 : f32
    %255 = vector.broadcast %cst_111 : f32 to vector<16x1xf32>
    %256 = arith.addf %252, %255 : vector<16x1xf32>
    %257 = math.rsqrt %256 : vector<16x1xf32>
    %258 = vector.broadcast %257 : vector<16x1xf32> to vector<16x32xf32>
    %259 = arith.mulf %254, %258 : vector<16x32xf32>
    %260 = vector.broadcast %240 : vector<1x32xf32> to vector<16x32xf32>
    %261 = arith.mulf %259, %260 : vector<16x32xf32>
    %262 = vector.broadcast %241 : vector<1x32xf32> to vector<16x32xf32>
    %263 = arith.addf %261, %262 : vector<16x32xf32>
    %cst_112 = arith.constant dense<0.000000e+00> : vector<16x64xf32>
    %264 = tpu.matmul %263, %193, %cst_112 {dimension_numbers = #tpu.dot_dimension_numbers<[1], [0], [0], [1], [0, 0, 1, 1], [], []>} : vector<16x32xf32>, vector<32x64xf32>, vector<16x64xf32> -> vector<16x64xf32>
    %265 = vector.broadcast %199 : vector<1x64xf32> to vector<16x64xf32>
    %266 = arith.addf %264, %265 : vector<16x64xf32>
    %cst_113 = arith.constant 5.000000e-01 : f32
    %267 = vector.broadcast %cst_113 : f32 to vector<16x64xf32>
    %268 = arith.mulf %267, %266 : vector<16x64xf32>
    %cst_114 = arith.constant 4.471500e-02 : f32
    %269 = vector.broadcast %cst_114 : f32 to vector<16x64xf32>
    %270 = arith.mulf %269, %266 : vector<16x64xf32>
    %271 = arith.mulf %270, %266 : vector<16x64xf32>
    %272 = arith.mulf %271, %266 : vector<16x64xf32>
    %273 = arith.addf %266, %272 : vector<16x64xf32>
    %cst_115 = arith.constant 0.797884583 : f32
    %274 = vector.broadcast %cst_115 : f32 to vector<16x64xf32>
    %275 = arith.mulf %274, %273 : vector<16x64xf32>
    %276 = math.tanh %275 : vector<16x64xf32>
    %cst_116 = arith.constant 1.000000e+00 : f32
    %277 = vector.broadcast %cst_116 : f32 to vector<16x64xf32>
    %278 = arith.addf %277, %276 : vector<16x64xf32>
    %279 = arith.mulf %268, %278 : vector<16x64xf32>
    %cst_117 = arith.constant dense<0.000000e+00> : vector<16x32xf32>
    %280 = tpu.matmul %279, %195, %cst_117 {dimension_numbers = #tpu.dot_dimension_numbers<[1], [0], [0], [1], [0, 0, 1, 1], [], []>} : vector<16x64xf32>, vector<64x32xf32>, vector<16x32xf32> -> vector<16x32xf32>
    %281 = vector.extract_strided_slice %197 {offsets = [6, 0], sizes = [1, 32], strides = [1, 1]} : vector<9x32xf32> to vector<1x32xf32>
    %282 = vector.broadcast %281 : vector<1x32xf32> to vector<16x32xf32>
    %283 = arith.addf %280, %282 : vector<16x32xf32>
    %284 = arith.addf %263, %283 : vector<16x32xf32>
    %285 = vector.extract_strided_slice %197 {offsets = [7, 0], sizes = [1, 32], strides = [1, 1]} : vector<9x32xf32> to vector<1x32xf32>
    %286 = vector.extract_strided_slice %197 {offsets = [8, 0], sizes = [1, 32], strides = [1, 1]} : vector<9x32xf32> to vector<1x32xf32>
    %cst_118 = arith.constant dense<0.000000e+00> : vector<16xf32>
    %287 = vector.multi_reduction <add>, %284, %cst_118 [1] : vector<16x32xf32> to vector<16xf32>
    %288 = vector.shape_cast %287 : vector<16xf32> to vector<16x1xf32>
    %cst_119 = arith.constant 3.200000e+01 : f32
    %289 = vector.broadcast %cst_119 : f32 to vector<16x1xf32>
    %290 = arith.divf %288, %289 : vector<16x1xf32>
    %291 = vector.broadcast %290 : vector<16x1xf32> to vector<16x32xf32>
    %292 = arith.subf %284, %291 : vector<16x32xf32>
    %293 = arith.mulf %292, %292 : vector<16x32xf32>
    %cst_120 = arith.constant dense<0.000000e+00> : vector<16xf32>
    %294 = vector.multi_reduction <add>, %293, %cst_120 [1] : vector<16x32xf32> to vector<16xf32>
    %295 = vector.shape_cast %294 : vector<16xf32> to vector<16x1xf32>
    %cst_121 = arith.constant 3.200000e+01 : f32
    %296 = vector.broadcast %cst_121 : f32 to vector<16x1xf32>
    %297 = arith.divf %295, %296 : vector<16x1xf32>
    %298 = vector.broadcast %290 : vector<16x1xf32> to vector<16x32xf32>
    %299 = arith.subf %284, %298 : vector<16x32xf32>
    %cst_122 = arith.constant 9.99999996E-13 : f32
    %300 = vector.broadcast %cst_122 : f32 to vector<16x1xf32>
    %301 = arith.addf %297, %300 : vector<16x1xf32>
    %302 = math.rsqrt %301 : vector<16x1xf32>
    %303 = vector.broadcast %302 : vector<16x1xf32> to vector<16x32xf32>
    %304 = arith.mulf %299, %303 : vector<16x32xf32>
    %305 = vector.broadcast %285 : vector<1x32xf32> to vector<16x32xf32>
    %306 = arith.mulf %304, %305 : vector<16x32xf32>
    %307 = vector.broadcast %286 : vector<1x32xf32> to vector<16x32xf32>
    %308 = arith.addf %306, %307 : vector<16x32xf32>
    %c0_123 = arith.constant 0 : index
    %c0_124 = arith.constant 0 : index
    %309 = vector.load %arg13[%c0_123, %c0_124] : memref<32x32xf32, #tpu.memory_space<vmem>>, vector<32x32xf32>
    %cst_125 = arith.constant dense<0.000000e+00> : vector<16x32xf32>
    %310 = tpu.matmul %308, %309, %cst_125 {dimension_numbers = #tpu.dot_dimension_numbers<[1], [0], [0], [1], [0, 0, 1, 1], [], []>} : vector<16x32xf32>, vector<32x32xf32>, vector<16x32xf32> -> vector<16x32xf32>
    %c0_126 = arith.constant 0 : index
    %c0_127 = arith.constant 0 : index
    %311 = vector.load %arg14[%c0_126, %c0_127] : memref<1x32xf32, #tpu.memory_space<vmem>>, vector<1x32xf32>
    %312 = vector.broadcast %311 : vector<1x32xf32> to vector<16x32xf32>
    %313 = arith.addf %310, %312 : vector<16x32xf32>
    %314 = math.tanh %313 : vector<16x32xf32>
    %c0_128 = arith.constant 0 : index
    %c0_129 = arith.constant 0 : index
    %315 = vector.load %arg15[%c0_128, %c0_129] : memref<32x128xf32, #tpu.memory_space<vmem>>, vector<32x128xf32>
    %cst_130 = arith.constant dense<0.000000e+00> : vector<16x128xf32>
    %316 = tpu.matmul %314, %315, %cst_130 {dimension_numbers = #tpu.dot_dimension_numbers<[1], [0], [0], [1], [0, 0, 1, 1], [], []>} : vector<16x32xf32>, vector<32x128xf32>, vector<16x128xf32> -> vector<16x128xf32>
    %c0_131 = arith.constant 0 : index
    %c0_132 = arith.constant 0 : index
    %317 = vector.load %arg16[%c0_131, %c0_132] : memref<1x128xf32, #tpu.memory_space<vmem>>, vector<1x128xf32>
    %318 = vector.broadcast %317 : vector<1x128xf32> to vector<16x128xf32>
    %319 = arith.addf %316, %318 : vector<16x128xf32>
    %c0_133 = arith.constant 0 : index
    %c0_134 = arith.constant 0 : index
    %320 = vector.load %arg17[%c0_133, %c0_134] : memref<16x128xf32, #tpu.memory_space<vmem>>, vector<16x128xf32>
    tpu.vector_store %arg17[%c0_133, %c0_134], %319 {strides = array<i32>} : memref<16x128xf32, #tpu.memory_space<vmem>>, vector<16x128xf32>,
    return
  }
}

</mosaic_0001>

<bundles_post_ra>
// kernel: sentiment_classifier_forward.1
= control target key start
LH: loop header
LB: loop body
LE: loop exit
PB: predicated region body
PF: predicated region fallthrough
CT: control target
= control target key end

     0   :  { %s4298_s0 = inlined_call_operand.vmem [shape: s32[16,1], index: 0, kind: input, shape index: {}]   ;;  %s4299_s1 = inlined_call_operand.vmem [shape: s32[2,8], index: 1, kind: input, shape index: {}]   ;;  %s4300_s2 = inlined_call_operand.vmem [shape: f32[128,32], index: 2, kind: input, shape index: {}]   ;;  %s4301_s3 = inlined_call_operand.hbm [shape: f32[16,32], index: 3, kind: input, shape index: {}]   ;;  %s4302_s4 = inlined_call_operand.hbm [shape: f32[2,32], index: 4, kind: input, shape index: {}]   ;;  %s4303_s5 = inlined_call_operand.hbm [shape: f32[2,32], index: 5, kind: input, shape index: {}]   ;;  %s4304_s6 = inlined_call_operand.vmem [shape: f32[4,32], index: 6, kind: input, shape index: {}]   ;;  %s4305_s7 = inlined_call_operand.hbm [shape: f32[32,32], index: 7, kind: input, shape index: {}]   ;;  %s4306_s8 = inlined_call_operand.vmem [shape: f32[2,4,32,32], index: 8, kind: input, shape index: {}]   ;;  %s4307_s9 = inlined_call_operand.vmem [shape: f32[2,32,64], index: 9, kind: input, shape index: {}]   ;;  %s4308_s10 = inlined_call_operand.vmem [shape: f32[2,64,32], index: 10, kind: input, shape index: {}]   ;;  %s4309_s11 = inlined_call_operand.vmem [shape: f32[2,9,32], index: 11, kind: input, shape index: {}]   ;;  %s4310_s12 = inlined_call_operand.hbm [shape: f32[2,1,64], index: 12, kind: input, shape index: {}]   ;;  %s4311_s13 = inlined_call_operand.vmem [shape: f32[32,32], index: 13, kind: input, shape index: {}]   ;;  %s4312_s14 = inlined_call_operand.hbm [shape: f32[1,32], index: 14, kind: input, shape index: {}]   ;;  %s4313_s15 = inlined_call_operand.hbm [shape: f32[32,128], index: 15, kind: input, shape index: {}]   ;;  %s4314_s16 = inlined_call_operand.hbm [shape: f32[1,128], index: 16, kind: input, shape index: {}]   ;;  %s4315_s17 = inlined_call_operand.vmem [shape: f32[16,128], index: 17, kind: output, shape index: {}]  }
   0x1   :  { %4317 = sst [smem:[#allocation20_spill]] %s4298_s0 }
   0x2   :  { %4318 = sst [smem:[#allocation21_spill]] %s4299_s1 }
   0x3   :  { %22 = vsyncpa [#allocation3], 0 }
   0x4   :  { %23 = vsyncpa [#allocation5], 0 }
   0x5   :  { %24 = vsyncpa [#allocation8], 0 }
   0x6   :  { %25 = vsyncpa [#allocation11], 0 }
   0x7   :  { %26 = vsyncpa [#allocation14], 0  ;;  %s3571_s24 = smov [#allocation4]  }
   0x8   :  { %s51_s25 = sshll.u32 %s3571_s24, 4  ;;  %s52_s25 = int_to_ptr.vmem [resolvable:$true] %s51_s25 }
   0x9   :  { %s3409_s26 = scalar_lea.vmem %s52_s25, 32  ;;  %p3414_p1 = scmp.lt.s32.totalorder %s52_s25, %s52_s25 }
   0xa   :  { %p3410_p0 = scmp.ne.s32.totalorder %s52_s25, %s3409_s26  ;;  %p3415_p2 = scmp.lt.s32.totalorder %s3409_s26, %s3409_s26 }
   0xc   :  { %p3416_p3 = por %p3415_p2, %p3414_p1 }
   0xe   :  { %p3417_p4 = pnand %p3416_p3, %p3410_p0 }
  0x10   :  { %3420 = shalt.err (!%p3417_p4)
}
  0x11   :  { %54 = dma.hbm_to_vmem [thread:$0]  %s4302_s4, 32, %s52_s25, [#allocation5]  }
  0x12   :  { %s3572_s29 = smov [#allocation7]   ;;  %s3573_s30 = smov [#allocation10]  }
  0x13   :  { %s72_s0 = sshll.u32 %s3572_s29, 4  ;;  %s107_s18 = sshll.u32 %s3573_s30, 4  ;;  %s73_s0 = int_to_ptr.vmem [resolvable:$true] %s72_s0  ;;  %s108_s18 = int_to_ptr.vmem [resolvable:$true] %s107_s18 }
  0x14   :  { %s3429_s19 = scalar_lea.vmem %s73_s0, 512  ;;  %p3434_p6 = scmp.lt.s32.totalorder %s73_s0, %s73_s0 }
  0x15   :  { %p3430_p5 = scmp.ne.s32.totalorder %s73_s0, %s3429_s19  ;;  %p3435_p7 = scmp.lt.s32.totalorder %s3429_s19, %s3429_s19 }
  0x17   :  { %p3436_p8 = por %p3435_p7, %p3434_p6 }
  0x19   :  { %p3437_p9 = pnand %p3436_p8, %p3430_p5 }
  0x1b   :  { %3440 = shalt.err (!%p3437_p9)
}
  0x1c   :  { %s3574_s1 = smov 128   ;;  %s3575_s20 = smov 8  }
  0x1d   :  { %78 = dma.hbm_to_vmem [thread:$0]  %s4305_s7, 512, %s73_s0, [#allocation8], %s3574_s1, %s3574_s1, %s3575_s20  }
  0x1e   :  { %s3449_s4 = scalar_lea.vmem %s108_s18, 16  ;;  %s3453_s23 = scalar_lea.vmem %s108_s18, 32 }
  0x1f   :  { %p3450_p10 = scmp.ne.s32.totalorder %s108_s18, %s3449_s4  ;;  %p3454_p11 = scmp.lt.s32.totalorder %s108_s18, %s108_s18 }
  0x20   :  { %p3455_p12 = scmp.lt.s32.totalorder %s3453_s23, %s3449_s4 }
  0x22   :  { %p3456_p13 = por %p3455_p12, %p3454_p11 }
  0x24   :  { %p3457_p0 = pnand %p3456_p13, %p3450_p10 }
  0x26   :  { %3460 = shalt.err (!%p3457_p0)
}
  0x27   :  { %110 = dma.hbm_to_vmem [thread:$0]  %s4312_s14, 16, %s108_s18, [#allocation11]  }
  0x28   :  { %s3576_s26 = smov [#allocation2]   ;;  %s3577_s28 = smov [#allocation6]  }
  0x29   :  { %s38_s27 = sshll.u32 %s3576_s26, 4  ;;  %s61_s29 = sshll.u32 %s3577_s28, 4  ;;  %s39_s27 = int_to_ptr.vmem [resolvable:$true] %s38_s27  ;;  %s62_s29 = int_to_ptr.vmem [resolvable:$true] %s61_s29 }
  0x2a   :  { %s3469_s30 = scalar_lea.vmem %s39_s27, 256  ;;  %p3474_p2 = scmp.lt.s32.totalorder %s39_s27, %s39_s27 }
  0x2b   :  { %p3470_p1 = scmp.ne.s32.totalorder %s39_s27, %s3469_s30  ;;  %p3475_p3 = scmp.lt.s32.totalorder %s3469_s30, %s3469_s30 }
  0x2d   :  { %p3476_p4 = por %p3475_p3, %p3474_p2 }
  0x2f   :  { %p3477_p5 = pnand %p3476_p4, %p3470_p1 }
  0x31   :  { %3480 = shalt.err (!%p3477_p5)
}
  0x32   :  { %44 = dma.hbm_to_vmem [thread:$0]  %s4301_s3, 256, %s39_s27, [#allocation3], %s3574_s1, %s3574_s1, %s3575_s20  }
  0x33   :  { %s3489_s14 = scalar_lea.vmem %s62_s29, 32  ;;  %p3494_p7 = scmp.lt.s32.totalorder %s62_s29, %s62_s29 }
  0x34   :  { %p3490_p6 = scmp.ne.s32.totalorder %s62_s29, %s3489_s14  ;;  %p3495_p8 = scmp.lt.s32.totalorder %s3489_s14, %s3489_s14 }
  0x36   :  { %p3496_p9 = por %p3495_p8, %p3494_p7 }
  0x38   :  { %p3497_p10 = pnand %p3496_p9, %p3490_p6 }
  0x3a   :  { %3500 = shalt.err (!%p3497_p10)
}
  0x3b   :  { %64 = dma.hbm_to_vmem [thread:$0]  %s4303_s5, 32, %s62_s29, [#allocation5]  }
  0x3c   :  { %s3578_s21 = smov [#allocation9]  }
  0x3d   :  { %s92_s22 = sshll.u32 %s3578_s21, 4  ;;  %s93_s22 = int_to_ptr.vmem [resolvable:$true] %s92_s22 }
  0x3e   :  { %s3509_s4 = scalar_lea.vmem %s93_s22, 32  ;;  %p3514_p12 = scmp.lt.s32.totalorder %s93_s22, %s93_s22 }
  0x3f   :  { %p3510_p11 = scmp.ne.s32.totalorder %s93_s22, %s3509_s4  ;;  %p3515_p13 = scmp.lt.s32.totalorder %s3509_s4, %s3509_s4 }
  0x41   :  { %p3516_p0 = por %p3515_p13, %p3514_p12 }
  0x43   :  { %p3517_p1 = pnand %p3516_p0, %p3510_p11 }
  0x45   :  { %3520 = shalt.err (!%p3517_p1)
}
  0x46   :  { %s3579_s3 = smov 16   ;;  %s3580_s23 = smov 1  }
  0x47   :  { %98 = dma.hbm_to_vmem [thread:$0]  %s4310_s12, 32, %s93_s22, [#allocation8], %s3579_s3, %s3579_s3, %s3580_s23  }
  0x48   :  { %s3581_s26 = smov [#allocation12]   ;;  %s3582_s27 = smov [#allocation13]  }
  0x49   :  { %s116_s5 = sshll.u32 %s3581_s26, 4  ;;  %s129_s28 = sshll.u32 %s3582_s27, 4  ;;  %s117_s5 = int_to_ptr.vmem [resolvable:$true] %s116_s5  ;;  %s130_s28 = int_to_ptr.vmem [resolvable:$true] %s129_s28 }
  0x4a   :  { %s3529_s29 = scalar_lea.vmem %s117_s5, 512  ;;  %p3534_p3 = scmp.lt.s32.totalorder %s117_s5, %s117_s5 }
  0x4b   :  { %p3530_p2 = scmp.ne.s32.totalorder %s117_s5, %s3529_s29  ;;  %p3535_p4 = scmp.lt.s32.totalorder %s3529_s29, %s3529_s29 }
  0x4d   :  { %p3536_p5 = por %p3535_p4, %p3534_p3 }
  0x4f   :  { %p3537_p6 = pnand %p3536_p5, %p3530_p2 }
  0x51   :  { %3540 = shalt.err (!%p3537_p6)
}
  0x52   :  { %122 = dma.hbm_to_vmem [thread:$0]  %s4313_s15, 512, %s117_s5, [#allocation11], %s3574_s1, %s3574_s1, %s3575_s20  }
  0x53   :  { %s3549_s12 = scalar_lea.vmem %s130_s28, 16  ;;  %s3553_s0 = scalar_lea.vmem %s130_s28, 32 }
  0x54   :  { %p3550_p7 = scmp.ne.s32.totalorder %s130_s28, %s3549_s12  ;;  %p3554_p8 = scmp.lt.s32.totalorder %s130_s28, %s130_s28 }
  0x55   :  { %p3555_p9 = scmp.lt.s32.totalorder %s3553_s0, %s3549_s12 }
  0x57   :  { %p3556_p10 = por %p3555_p9, %p3554_p8 }
  0x59   :  { %p3557_p11 = pnand %p3556_p10, %p3550_p7 }
  0x5b   :  { %3560 = shalt.err (!%p3557_p11)
}
  0x5c   :  { %132 = dma.hbm_to_vmem [thread:$0]  %s4314_s16, 16, %s130_s28, [#allocation14]  }
  0x5d   :  { %3561 = dma.done.wait [#allocation3], 256  }
  0x5e   :  { %3562 = vsyncadd [#allocation3], 4294967040 }
  0x5f   :  { %3563 = dma.done.wait [#allocation5], 64  }
  0x60   :  { %3564 = vsyncadd [#allocation5], 4294967232 }
  0x61   :  { %3565 = dma.done.wait [#allocation8], 544  }
  0x62   :  { %3566 = vsyncadd [#allocation8], 4294966752 }
  0x63   :  { %3567 = dma.done.wait [#allocation11], 528  }
  0x64   :  { %3568 = vsyncadd [#allocation11], 4294966768 }
  0x65   :  { %3569 = dma.done.wait [#allocation14], 16  }
  0x66   :  { %3570 = vsyncadd [#allocation14], 4294967280  ;;  %v3583_v0 = vmov 0   ;;  %s4319_s19 = sld [smem:[#allocation20_spill]]  ;;  %v188_v2 = vld [vmem:[%s4300_s2 + $0x78] sm:$0xff]  ;;  %v187_v3 = vld [vmem:[%s4300_s2 + $0x70] sm:$0xff]  ;;  %v159_v19 = vlaneseq }
  0x67   :  { %3352 = vset.pattern.permute.xlu0 %v3583_v0  ;;  %3019 = vmatprep.subr.mxu0 %v188_v2  ;;  %v186_v5 = vld [vmem:[%s4300_s2 + $0x68] sm:$0xff]  ;;  %v185_v6 = vld [vmem:[%s4300_s2 + $0x60] sm:$0xff]  ;;  %v184_v7 = vld [vmem:[%s4300_s2 + $0x58] sm:$0xff]  ;;  %v3584_v22 = vmov 1.0   ;;  %vm275_vm2 = vcmask 261120   ;;  %vm3586_vm3 = vmmov 0  }
  0x68   :  { %3020 = vmatpush3.msra.mxu0 %v188_v2  ;;  %v183_v8 = vld [vmem:[%s4300_s2 + $0x50] sm:$0xff]  ;;  %v182_v9 = vld [vmem:[%s4300_s2 + $0x48] sm:$0xff]  ;;  %v181_v10 = vld [vmem:[%s4300_s2 + $0x40] sm:$0xff]  ;;  %v160_v20 = vand.u32 127, %v159_v19  ;;  %v3787_v55 = vshrl.u32 %v159_v19, 7  ;;  %s4320_s14 = sld [smem:[#allocation21_spill]] }
  0x69   :  { %3021 = vmatprep.subr.mxu0 %v187_v3  ;;  %v180_v11 = vld [vmem:[%s4300_s2 + $0x38] sm:$0xff]  ;;  %v179_v12 = vld [vmem:[%s4300_s2 + $0x30] sm:$0xff]  ;;  %v178_v13 = vld [vmem:[%s4300_s2 + $0x28] sm:$0xff]  ;;  %s3587_s18 = smov 24   ;;  %vm379_vm4 = vcmask 64512   ;;  %vm381_vm5 = vcmask 130048  }
  0x6a   :  { %3022 = vmatpush3.msra.mxu0 %v187_v3  ;;  %v177_v14 = vld [vmem:[%s4300_s2 + $0x20] sm:$0xff]  ;;  %v176_v15 = vld [vmem:[%s4300_s2 + $0x18] sm:$0xff]  ;;  %v175_v16 = vld [vmem:[%s4300_s2 + $0x10] sm:$0xff]  ;;  %v3790_v56 = vsub.s32 0, %v3787_v55  ;;  %v3793_v58 = vsub.s32 1, %v3787_v55  ;;  %vm383_vm6 = vcmask 195584  }
  0x6b   :  { %3023 = vmatprep.subr.mxu0 %v186_v5  ;;  %v174_v17 = vld [vmem:[%s4300_s2 + $0x8] sm:$0xff]  ;;  %v173_v18 = vld [vmem:[%s4300_s2] sm:$0xff]  ;;  %v2751_v29 = vld [vmem:[#allocation4] ss:$0 sm:$0xff]  ;;  %vm1360_vm7 = vcmask 523264  }
  0x6c   :  { %v157_v1 = vld [vmem:[%s4319_s19] sm:$0xff]  ;;  %v158_v4 = vld [vmem:[%s4319_s19 + $0x8] sm:$0xff]  ;;  %3024 = vmatpush3.msra.mxu0 %v186_v5  ;;  %v421_v44 = vld [vmem:[%s4306_s8 + $0x18] sm:$0xff] }
  0x6d   :  { %162 = vperm.xlu0 %3352, %v157_v1   ;;  %3025 = vmatprep.subr.mxu0 %v185_v6  ;;  %v264_v25 = vld [vmem:[#allocation2] sm:$0xff]  ;;  %v420_v45 = vld [vmem:[%s4306_s8 + $0x10] sm:$0xff]  ;;  %v419_v46 = vld [vmem:[%s4306_s8 + $0x8] sm:$0xff] }
  0x6e   :  { %3026 = vmatpush3.msra.mxu0 %v185_v6  ;;  %3054 = vmatprep.subr.mxu1 %v421_v44  ;;  %v418_v47 = vld [vmem:[%s4306_s8] sm:$0xff]  ;;  %v2756_v48 = vld [vmem:[%s4306_s8 + $0x38] sm:$0xff]  ;;  %v274_v57 = vld [vmem:[#allocation6] sm:$0x3] }
  0x6f   :  { %3027 = vmatprep.subr.mxu0 %v184_v7  ;;  %3055 = vmatpush3.msra.mxu1 %v421_v44  ;;  %v306_v59 = vrot.slane %v274_v57, %v3790_v56  ;;  %v312_v62 = vrot.slane %v274_v57, %v3793_v58  ;;  %v2755_v5 = vld [vmem:[%s4306_s8 + $0x30] sm:$0xff]  ;;  %v2754_v6 = vld [vmem:[%s4306_s8 + $0x28] sm:$0xff] }
  0x70   :  { %3028 = vmatpush3.msra.mxu0 %v184_v7  ;;  %3056 = vmatprep.subr.mxu1 %v420_v45  ;;  %v2753_v7 = vld [vmem:[%s4306_s8 + $0x20] sm:$0xff] }
  0x71   :  { %165 = vperm.xlu0 %3352, %v158_v4   ;;  %3029 = vmatprep.subr.mxu0 %v183_v8 }
  0x72   :  { %3030 = vmatpush3.msra.mxu0 %v183_v8  ;;  %3057 = vmatpush3.msra.mxu1 %v420_v45  ;;  %v2760_v8 = vld [vmem:[%s4306_s8 + $0x58] sm:$0xff] }
  0x73   :  { %3031 = vmatprep.subr.mxu0 %v182_v9  ;;  %3058 = vmatprep.subr.mxu1 %v419_v46 }
  0x74   :  { %3032 = vmatpush3.msra.mxu0 %v182_v9  ;;  %3059 = vmatpush3.msra.mxu1 %v419_v46  ;;  %v2759_v9 = vld [vmem:[%s4306_s8 + $0x50] sm:$0xff] }
  0x75   :  { %3033 = vmatprep.subr.mxu0 %v181_v10  ;;  %3060 = vmatprep.subr.mxu1 %v418_v47 }
  0x76   :  { %3034 = vmatpush3.msra.mxu0 %v181_v10  ;;  %3061 = vmatpush3.msra.mxu1 %v418_v47  ;;  %v2758_v10 = vld [vmem:[%s4306_s8 + $0x48] sm:$0xff] }
  0x77   :  { %3035 = vmatprep.subr.mxu0 %v180_v11  ;;  %3065 = vmatprep.subr.mxu1 %v2756_v48 }
  0x78   :  { %3036 = vmatpush3.msra.mxu0 %v180_v11  ;;  %v2757_v11 = vld [vmem:[%s4306_s8 + $0x40] sm:$0xff] }
  0x79   :  { %3037 = vmatprep.subr.mxu0 %v179_v12 }
  0x7a   :  { %3038 = vmatpush3.msra.mxu0 %v179_v12  ;;  %v3585_v12 = vmov 0.0  }
  0x7b   :  { %3039 = vmatprep.subr.mxu0 %v178_v13 }
  0x7c   :  { %3040 = vmatpush3.msra.mxu0 %v178_v13  ;;  %v365_v13 = vld [vmem:[%s4320_s14] sm:$0x3] }
  0x7d   :  { %3041 = vmatprep.subr.mxu0 %v177_v14 }
  0x7e   :  { %3042 = vmatpush3.msra.mxu0 %v177_v14  ;;  %v366_v14 = vcvt.s32.f32 %v365_v13 }
  0x7f   :  { %3043 = vmatprep.subr.mxu0 %v176_v15 }
  0x80   :  { %3044 = vmatpush3.msra.mxu0 %v176_v15  ;;  %v367_v15 = vsub.f32 1.0, %v366_v14 }
  0x81   :  { %3045 = vmatprep.subr.mxu0 %v175_v16 }
  0x82   :  { %3046 = vmatpush3.msra.mxu0 %v175_v16  ;;  %v3843_v16 = vmul.f32 -10000.0, %v367_v15 }
  0x83   :  { %3047 = vmatprep.subr.mxu0 %v174_v17 }
  0x84   :  { %3048 = vmatpush3.msra.mxu0 %v174_v17  ;;  %v3588_v17 = vmov 1966171168  }
  0x85   :  { %3049 = vmatprep.subr.mxu0 %v173_v18 }
  0x86   :  { %3050 = vmatpush3.msra.mxu0 %v173_v18  ;;  %v326_v18 = vunpack.c.l.s4 %v3588_v17 }
  0x87   :  { %3098 = vmatprep.subr.mxu0 %v3585_v12 }
  0x88   :  { %v327_v19 = vunpack.c.0.s8 %v326_v18 }
  0xe8   :  { %v163_v21 = vpop.permute.xlu0 %162 }
  0xe9   :  { %vm167_vm0 = vcmp.eq.s32.totalorder %v163_v21, %v160_v20  ;;  %v3854_v21 = vsub.s32 %v327_v19, %v3787_v55 }
  0xea   :  { %3051 = vmatprep.mubr.msk.f32.mxu0 %vm167_vm0, %v3584_v22 }
  0xec   :  { %v166_v23 = vpop.permute.xlu0 %165 }
  0xed   :  { %vm168_vm1 = vcmp.eq.s32.totalorder %v166_v23, %v160_v20  ;;  %v2752_v20 = vld.sshfl [vmem:[%s4304_s6] sm:$0x33 pattern:$0x75316420] }
  0xee   :  { %3052 = vmatmul.mubr.msk.f32.vlgmr.msra.gmra.mxu0 %vm168_vm1, %v3584_v22  ;;  %v324_v22 = vcombine.high %v2752_v20, %v2752_v20 }
  0xef   :  { %3106 = vmatprep.mubr.msk.f32.mxu0 %vm3586_vm3, %v3585_v12 }
  0xf0   :  { %v338_v23 = vrot.slane %v324_v22, %v3854_v21 }
 0x1ae   :  { %v3053_v24 = vpop.f32.mrf.mxu0 }
 0x1af   :  { %v266_v27 = vadd.f32 %v3053_v24, %v264_v25 }
 0x1b0   :  { %v255_v26 = vpop.f32.mrf.mxu0 }
 0x1b1   :  { %v265_v28 = vadd.f32 %v264_v25, %v255_v26  ;;  %v273_v32 = vadd.f32 %v2751_v29, %v266_v27  ;;  %v331_v25 = vrot.slane %v2752_v20, %v3854_v21  ;;  %v340_v26 = vcombine.high %v338_v23, %v338_v23  ;;  %v3861_v27 = vld [vmem:[%s4309_s11] sm:$0xff] }
 0x1b3   :  { %v272_v30 = vadd.f32 %v2751_v29, %v265_v28  ;;  %v279_v33 = vsel %vm275_vm2, %v273_v32, 0.0  ;;  %v540_v28 = vrot.slane %v3861_v27, %v3793_v58  ;;  %v3891_v46 = vrot.slane %v331_v25, %v3790_v56 }
 0x1b5   :  { %v276_v31 = vsel %vm275_vm2, %v272_v30, 0.0 }
 0x1b6   :  { %277 = vadd.xlane.f32.xlu1 %v276_v31  ;;  %v3866_v31 = vrot.slane %v340_v26, %v3790_v56 }
 0x1ba   :  { %280 = vadd.xlane.f32.xlu1 %v279_v33 }
 0x23f   :  { %v278_v34 = vpop.xlane.xlu1 %277 }
 0x240   :  { %v283_v35 = vmul.f32 0.03125, %v278_v34  ;;  %v618_v34 = vsub.s32 2, %v3787_v55 }
 0x242   :  { %v285_v36 = vsub.f32 %v272_v30, %v283_v35  ;;  %v339_v30 = vcombine.high %v331_v25, %v331_v25  ;;  %v3943_v25 = vld [vmem:[#allocation7] sm:$0xff] }
 0x243   :  { %v281_v37 = vpop.xlane.xlu1 %280 }
 0x244   :  { %v284_v38 = vmul.f32 0.03125, %v281_v37  ;;  %v287_v39 = vmul.f32 %v285_v36, %v285_v36 }
 0x246   :  { %v286_v40 = vsub.f32 %v273_v32, %v284_v38  ;;  %v289_v41 = vsel %vm275_vm2, %v287_v39, 0.0  ;;  %v619_v39 = vrot.slane %v3861_v27, %v618_v34 }
 0x247   :  { %290 = vadd.xlane.f32.xlu0 %v289_v41  ;;  %v3880_v41 = vrot.slane %v338_v23, %v3790_v56  ;;  %v3935_v23 = vld [vmem:[#allocation7 + $0x10] sm:$0xff] }
 0x248   :  { %v288_v42 = vmul.f32 %v286_v40, %v286_v40 }
 0x24a   :  { %v292_v43 = vsel %vm275_vm2, %v288_v42, 0.0 }
 0x24b   :  { %293 = vadd.xlane.f32.xlu1 %v292_v43 }
 0x25c   :  { %370 = vrot.lane.b32.xlu1 %v3843_v16, %s3575_s20 }
 0x260   :  { %373 = vrot.lane.b32.xlu1 %v3843_v16, %s3579_s3 }
 0x264   :  { %376 = vrot.lane.b32.xlu1 %v3843_v16, %s3587_s18 }
 0x2d0   :  { %v291_v49 = vpop.xlane.xlu0 %290 }
 0x2d1   :  { %v295_v50 = vmul.f32 0.03125, %v291_v49  ;;  %v455_v49 = vrot.slane %v3861_v27, %v3790_v56 }
 0x2d3   :  { %v297_v51 = vadd.f32 1e-12, %v295_v50 }
 0x2d4   :  { %v294_v52 = vpop.xlane.xlu1 %293 }
 0x2d5   :  { %3353 = vrsqrt.f32 %v297_v51  ;;  %v296_v53 = vmul.f32 0.03125, %v294_v52 }
 0x2d7   :  { %v298_v54 = vadd.f32 1e-12, %v296_v53 }
 0x2d9   :  { %3355 = vrsqrt.f32 %v298_v54 }
 0x2e2   :  { %v3354_v60 = vpop.eup %3353 }
 0x2e3   :  { %v301_v61 = vmul.f32 %v3354_v60, %v285_v36  ;;  %v3870_v36 = vrot.slane %v339_v30, %v3790_v56 }
 0x2e5   :  { %v307_v63 = vmul.f32 %v306_v59, %v301_v61 }
 0x2e6   :  { %v3356_v0 = vpop.eup %3355 }
 0x2e7   :  { %v3797_v1 = vadd.f32 %v312_v62, %v307_v63  ;;  %v302_v2 = vmul.f32 %v3356_v0, %v286_v40  ;;  %v371_v63 = vpop.permute.xlu1 %370 }
 0x2e9   :  { %3062 = vmatprep.mubr.msk.f32.mxu1 %vm275_vm2, %v3797_v1  ;;  %v308_v3 = vmul.f32 %v306_v59, %v302_v2  ;;  %v380_v2 = vsel %vm379_vm4, %v3843_v16, %v371_v63 }
 0x2eb   :  { %v3801_v4 = vadd.f32 %v312_v62, %v308_v3  ;;  %v374_v0 = vpop.permute.xlu1 %373 }
 0x2ec   :  { %v382_v3 = vsel %vm381_vm5, %v380_v2, %v374_v0 }
 0x2ed   :  { %3063 = vmatmul.mubr.msk.f32.vlgmr.msra.gmra.mxu1 %vm275_vm2, %v3801_v4 }
 0x2ee   :  { %3066 = vmatpush3.msra.mxu1 %v2756_v48  ;;  %3073 = vmatprep.mubr.msk.f32.mxu1 %vm275_vm2, %v3797_v1 }
 0x2ef   :  { %3067 = vmatprep.subr.mxu1 %v2755_v5 }
 0x2f0   :  { %3068 = vmatpush3.msra.mxu1 %v2755_v5  ;;  %v377_v5 = vpop.permute.xlu1 %376 }
 0x2f1   :  { %3069 = vmatprep.subr.mxu1 %v2754_v6 }
 0x2f2   :  { %3070 = vmatpush3.msra.mxu1 %v2754_v6  ;;  %v384_v6 = vsel %vm383_vm6, %v382_v3, %v377_v5 }
 0x2f3   :  { %3071 = vmatprep.subr.mxu1 %v2753_v7 }
 0x2f4   :  { %3072 = vmatpush3.msra.mxu1 %v2753_v7  ;;  %v392_v7 = vrot.slane %v384_v6, %v3854_v21 }
 0x2f5   :  { %3074 = vmatmul.mubr.msk.f32.vlgmr.msra.gmra.mxu1 %vm275_vm2, %v3801_v4  ;;  %3076 = vmatprep.subr.mxu1 %v2760_v8 }
 0x2f6   :  { %3077 = vmatpush3.msra.mxu1 %v2760_v8  ;;  %3084 = vmatprep.mubr.msk.f32.mxu1 %vm275_vm2, %v3797_v1  ;;  %v393_v8 = vcombine.high %v392_v7, %v392_v7 }
 0x2f7   :  { %3078 = vmatprep.subr.mxu1 %v2759_v9 }
 0x2f8   :  { %3079 = vmatpush3.msra.mxu1 %v2759_v9  ;;  %v407_v9 = vrot.slane %v393_v8, %v3854_v21 }
 0x2f9   :  { %3080 = vmatprep.subr.mxu1 %v2758_v10 }
 0x2fa   :  { %3081 = vmatpush3.msra.mxu1 %v2758_v10  ;;  %v400_v10 = vrot.slane %v392_v7, %v3854_v21  ;;  %v3933_v21 = vld [vmem:[#allocation7 + $0x18] sm:$0xff] }
 0x2fb   :  { %3082 = vmatprep.subr.mxu1 %v2757_v11 }
 0x2fc   :  { %3083 = vmatpush3.msra.mxu1 %v2757_v11  ;;  %v3924_v11 = vrot.slane %v407_v9, %v3790_v56  ;;  %v3928_v15 = vrot.slane %v400_v10, %v3790_v56 }
 0x2fd   :  { %3085 = vmatmul.mubr.msk.f32.vlgmr.msra.gmra.mxu1 %vm275_vm2, %v3801_v4  ;;  %3087 = vmatprep.subr.mxu1 %v3585_v12 }
 0x2fe   :  { %3095 = vmatprep.mubr.msk.f32.mxu1 %vm3586_vm3, %v3585_v12 }
 0x3ad   :  { %v3064_v24 = vpop.f32.mrf.mxu1 }
 0x3ae   :  { %v534_v53 = vadd.f32 %v3064_v24, %v455_v49  ;;  %v3939_v24 = vld [vmem:[#allocation7 + $0x8] sm:$0xff] }
 0x3af   :  { %v528_v29 = vpop.f32.mrf.mxu1 }
 0x3b0   :  { %v529_v59 = vadd.f32 %v528_v29, %v455_v49 }
 0x3b5   :  { %v3075_v32 = vpop.f32.mrf.mxu1 }
 0x3b6   :  { %v613_v33 = vadd.f32 %v3075_v32, %v540_v28 }
 0x3b7   :  { %v607_v35 = vpop.f32.mrf.mxu1 }
 0x3b8   :  { %v702_v37 = vmul.f32 %v613_v33, %v3866_v31  ;;  %v608_v38 = vadd.f32 %v607_v35, %v540_v28  ;;  %v701_v42 = vmul.f32 %v613_v33, %v3870_v36  ;;  %v700_v47 = vmul.f32 %v613_v33, %v3880_v41 }
 0x3b9   :  { %v699_v51 = vmul.f32 %v613_v33, %v3891_v46 }
 0x3ba   :  { %3099 = vmatpush3.xpose.msk.msra.mxu0 %vm275_vm2, %v702_v37  ;;  %v698_v40 = vmul.f32 %v608_v38, %v3866_v31  ;;  %v697_v45 = vmul.f32 %v608_v38, %v3870_v36  ;;  %v696_v50 = vmul.f32 %v608_v38, %v3880_v41  ;;  %v695_v54 = vmul.f32 %v608_v38, %v3891_v46 }
 0x3bb   :  { %3100 = vmatprep.subr.mxu0 %v3585_v12 }
 0x3bc   :  { %3088 = vmatpush3.xpose.msk.msra.mxu1 %vm275_vm2, %v698_v40 }
 0x3bd   :  { %v3086_v43 = vpop.f32.mrf.mxu1  ;;  %3089 = vmatprep.subr.mxu1 %v3585_v12 }
 0x3be   :  { %v3884_v44 = vadd.f32 %v3086_v43, %v619_v39  ;;  %3101 = vmatpush3.xpose.msk.msra.mxu0 %vm275_vm2, %v701_v42  ;;  %v2764_v43 = vld [vmem:[%s4306_s8 + $0x78] sm:$0xff] }
 0x3bf   :  { %3102 = vmatprep.subr.mxu0 %v3585_v12  ;;  %v686_v48 = vpop.f32.mrf.mxu1 }
 0x3c0   :  { %3090 = vmatpush3.xpose.msk.msra.mxu1 %vm275_vm2, %v697_v45  ;;  %v687_v52 = vadd.f32 %v686_v48, %v619_v39  ;;  %v710_v38 = vmul.f32 %v3884_v44, %v3866_v31  ;;  %v709_v39 = vmul.f32 %v3884_v44, %v3870_v36  ;;  %v708_v40 = vmul.f32 %v3884_v44, %v3880_v41 }
 0x3c1   :  { %3091 = vmatprep.subr.mxu1 %v3585_v12  ;;  %v707_v42 = vmul.f32 %v3884_v44, %v3891_v46  ;;  %v2763_v44 = vld [vmem:[%s4306_s8 + $0x70] sm:$0xff] }
 0x3c2   :  { %3103 = vmatpush3.xpose.msk.msra.mxu0 %vm275_vm2, %v700_v47  ;;  %v706_v57 = vmul.f32 %v687_v52, %v3866_v31  ;;  %v705_v60 = vmul.f32 %v687_v52, %v3870_v36  ;;  %v704_v61 = vmul.f32 %v687_v52, %v3880_v41  ;;  %v703_v62 = vmul.f32 %v687_v52, %v3891_v46  ;;  %v2762_v52 = vld [vmem:[%s4306_s8 + $0x68] sm:$0xff] }
 0x3c3   :  { %3104 = vmatprep.subr.mxu0 %v3585_v12 }
 0x3c4   :  { %3092 = vmatpush3.xpose.msk.msra.mxu1 %vm275_vm2, %v696_v50 }
 0x3c5   :  { %3093 = vmatprep.subr.mxu1 %v3585_v12 }
 0x3c6   :  { %3105 = vmatpush3.xpose.msk.msra.mxu0 %vm275_vm2, %v699_v51 }
 0x3c7   :  { %3120 = vmatprep.subr.mxu0 %v3585_v12 }
 0x3c8   :  { %3094 = vmatpush3.xpose.msk.msra.mxu1 %vm275_vm2, %v695_v54 }
 0x3c9   :  { %3107 = vmatmul.mubr.msk.f32.vlgmr.msra.gmra.mxu0 %vm275_vm2, %v534_v53  ;;  %3109 = vmatprep.subr.mxu1 %v3933_v21  ;;  %v2761_v53 = vld [vmem:[%s4306_s8 + $0x60] sm:$0xff] }
 0x3ca   :  { %3121 = vmatpush3.msra.mxu0 %v706_v57  ;;  %3128 = vmatprep.mubr.msk.f32.mxu0 %vm3586_vm3, %v3585_v12 }
 0x3cb   :  { %3122 = vmatprep.subr.mxu0 %v3585_v12  ;;  %3096 = vmatmul.mubr.msk.f32.vlgmr.msra.gmra.mxu1 %vm275_vm2, %v529_v59 }
 0x3cc   :  { %3123 = vmatpush3.msra.mxu0 %v705_v60  ;;  %3110 = vmatpush3.msra.mxu1 %v3933_v21 }
 0x3cd   :  { %3124 = vmatprep.subr.mxu0 %v3585_v12  ;;  %3111 = vmatprep.subr.mxu1 %v3935_v23 }
 0x3ce   :  { %3125 = vmatpush3.msra.mxu0 %v704_v61  ;;  %3112 = vmatpush3.msra.mxu1 %v3935_v23  ;;  %v1128_v61 = vsub.s32 3, %v3787_v55 }
 0x3cf   :  { %3126 = vmatprep.subr.mxu0 %v3585_v12  ;;  %3113 = vmatprep.subr.mxu1 %v3939_v24 }
 0x3d0   :  { %3127 = vmatpush3.msra.mxu0 %v703_v62  ;;  %3114 = vmatpush3.msra.mxu1 %v3939_v24  ;;  %v1129_v62 = vrot.slane %v3861_v27, %v1128_v61 }
 0x3d1   :  { %3115 = vmatprep.subr.mxu1 %v3943_v25  ;;  %3142 = vmatprep.subr.mxu0 %v2764_v43 }
 0x3d2   :  { %3116 = vmatpush3.msra.mxu1 %v3943_v25 }
 0x3d3   :  { %3131 = vmatprep.subr.mxu1 %v3585_v12 }
 0x489   :  { %v877_v13 = vpop.f32.mrf.mxu0 }
 0x48a   :  { %v882_v14 = vadd.f32 %v877_v13, %v3924_v11 }
 0x48b   :  { %v3108_v16 = vpop.f32.mrf.mxu0  ;;  %v792_v17 = vpop.f32.mrf.mxu1 }
 0x48c   :  { %v886_v18 = vsel %vm275_vm2, %v882_v14, -inf  ;;  %v881_v19 = vadd.f32 %v792_v17, %v3928_v15 }
 0x48d   :  { %887 = vmax.xlane.f32.xlu0 %v886_v18  ;;  %v3097_v20 = vpop.f32.mrf.mxu1 }
 0x48e   :  { %v883_v22 = vsel %vm275_vm2, %v881_v19, -inf }
 0x48f   :  { %884 = vmax.xlane.f32.xlu1 %v883_v22  ;;  %v439_v22 = vld [vmem:[%s4307_s9 + $0x10] sm:$0xff] }
 0x516   :  { %v888_v26 = vpop.xlane.xlu0 %887 }
 0x517   :  { %v890_v28 = vsub.f32 %v882_v14, %v888_v26  ;;  %v438_v26 = vld [vmem:[%s4307_s9 + $0x8] sm:$0xff] }
 0x518   :  { %v885_v29 = vpop.xlane.xlu1 %884 }
 0x519   :  { %v889_v30 = vsub.f32 %v881_v19, %v885_v29  ;;  %v893_v32 = vmul.f32 1.442695, %v890_v28  ;;  %v437_v28 = vld [vmem:[%s4307_s9] sm:$0xff] }
 0x51b   :  { %v891_v33 = vmul.f32 1.442695, %v889_v30 }
 0x51d   :  { %3357 = vpow2.f32 %v891_v33 }
 0x51e   :  { %3359 = vpow2.f32 %v893_v32 }
 0x52a   :  { %v3358_v35 = vpop.eup %3357 }
 0x52b   :  { %v3360_v37 = vpop.eup %3359  ;;  %3117 = vmatprep.mubr.msk.f32.mxu1 %vm275_vm2, %v3358_v35 }
 0x52c   :  { %3118 = vmatmul.mubr.msk.f32.vlgmr.msra.gmra.mxu1 %vm275_vm2, %v3360_v37 }
 0x52d   :  { %3132 = vmatpush3.msra.mxu1 %v710_v38  ;;  %3139 = vmatprep.mubr.msk.f32.mxu1 %vm3586_vm3, %v3585_v12  ;;  %v1241_v38 = vsub.s32 4, %v3787_v55 }
 0x52e   :  { %3133 = vmatprep.subr.mxu1 %v3585_v12 }
 0x52f   :  { %3134 = vmatpush3.msra.mxu1 %v709_v39  ;;  %v1247_v39 = vsub.s32 5, %v3787_v55 }
 0x530   :  { %3135 = vmatprep.subr.mxu1 %v3585_v12 }
 0x531   :  { %3136 = vmatpush3.msra.mxu1 %v708_v40  ;;  %v1242_v40 = vrot.slane %v3861_v27, %v1241_v38 }
 0x532   :  { %3137 = vmatprep.subr.mxu1 %v3585_v12 }
 0x533   :  { %3138 = vmatpush3.msra.mxu1 %v707_v42 }
 0x5ec   :  { %v3119_v45 = vpop.f32.mrf.mxu1 }
 0x5ed   :  { %3361 = vrcp.f32 %v3119_v45  ;;  %v1248_v45 = vrot.slane %v3861_v27, %v1247_v39 }
 0x5ee   :  { %v967_v47 = vpop.f32.mrf.mxu1 }
 0x5ef   :  { %3363 = vrcp.f32 %v967_v47 }
 0x5fa   :  { %v3362_v48 = vpop.eup %3361 }
 0x5fb   :  { %v979_v49 = vmul.f32 %v3362_v48, %v3360_v37 }
 0x5fc   :  { %v3364_v50 = vpop.eup %3363 }
 0x5fd   :  { %3140 = vmatmul.mubr.msk.f32.vlgmr.msra.gmra.mxu1 %vm275_vm2, %v979_v49  ;;  %v978_v51 = vmul.f32 %v3364_v50, %v3358_v35 }
 0x5ff   :  { %3129 = vmatmul.mubr.msk.f32.vlgmr.msra.gmra.mxu0 %vm275_vm2, %v978_v51 }
 0x600   :  { %3143 = vmatpush3.msra.mxu0 %v2764_v43 }
 0x601   :  { %3144 = vmatprep.subr.mxu0 %v2763_v44 }
 0x602   :  { %3145 = vmatpush3.msra.mxu0 %v2763_v44 }
 0x603   :  { %3146 = vmatprep.subr.mxu0 %v2762_v52 }
 0x604   :  { %3147 = vmatpush3.msra.mxu0 %v2762_v52  ;;  %v448_v52 = vld [vmem:[%s4308_s10 + $0x38] sm:$0xff] }
 0x605   :  { %3148 = vmatprep.subr.mxu0 %v2761_v53 }
 0x606   :  { %3149 = vmatpush3.msra.mxu0 %v2761_v53  ;;  %v447_v53 = vld [vmem:[%s4308_s10 + $0x30] sm:$0xff] }
 0x607   :  { %3164 = vmatprep.subr.mxu0 %v448_v52 }
 0x6bd   :  { %v1122_v54 = vpop.f32.mrf.mxu1 }
 0x6bf   :  { %v1049_v57 = vpop.f32.mrf.mxu0  ;;  %v3141_v59 = vpop.f32.mrf.mxu1 }
 0x6c0   :  { %3150 = vmatprep.mubr.msk.f32.mxu0 %vm275_vm2, %v1049_v57  ;;  %v445_v57 = vld [vmem:[%s4308_s10 + $0x20] sm:$0xff]  ;;  %v444_v59 = vld [vmem:[%s4308_s10 + $0x18] sm:$0xff] }
 0x6c1   :  { %v3130_v60 = vpop.f32.mrf.mxu0  ;;  %3151 = vmatmul.mubr.msk.f32.vlgmr.msra.gmra.mxu0 %vm275_vm2, %v1122_v54  ;;  %v446_v54 = vld [vmem:[%s4308_s10 + $0x28] sm:$0xff] }
 0x6c2   :  { %3165 = vmatpush3.msra.mxu0 %v448_v52  ;;  %v443_v60 = vld [vmem:[%s4308_s10 + $0x10] sm:$0xff] }
 0x6c3   :  { %3166 = vmatprep.subr.mxu0 %v447_v53 }
 0x6c4   :  { %3167 = vmatpush3.msra.mxu0 %v447_v53 }
 0x6c5   :  { %3168 = vmatprep.subr.mxu0 %v446_v54 }
 0x6c6   :  { %3169 = vmatpush3.msra.mxu0 %v446_v54 }
 0x6c7   :  { %3170 = vmatprep.subr.mxu0 %v445_v57 }
 0x6c8   :  { %3171 = vmatpush3.msra.mxu0 %v445_v57 }
 0x6c9   :  { %3172 = vmatprep.subr.mxu0 %v444_v59 }
 0x6ca   :  { %3173 = vmatpush3.msra.mxu0 %v444_v59 }
 0x6cb   :  { %3174 = vmatprep.subr.mxu0 %v443_v60 }
 0x6cc   :  { %3175 = vmatpush3.msra.mxu0 %v443_v60 }
 0x781   :  { %v3152_v63 = vpop.f32.mrf.mxu0 }
 0x782   :  { %v1208_v2 = vadd.f32 %v3152_v63, %v1129_v62  ;;  %v441_v63 = vld [vmem:[%s4308_s10] sm:$0xff] }
 0x783   :  { %v1202_v0 = vpop.f32.mrf.mxu0 }
 0x784   :  { %v1203_v3 = vadd.f32 %v1202_v0, %v1129_v62  ;;  %v1212_v7 = vadd.f32 %v1208_v2, %v3801_v4  ;;  %v440_v4 = vld [vmem:[%s4307_s9 + $0x18] sm:$0xff]  ;;  %v442_v62 = vld [vmem:[%s4308_s10 + $0x8] sm:$0xff]  ;;  %v2787_v0 = vld [vmem:[#allocation9] ss:$0 sm:$0xff] }
 0x785   :  { %3153 = vmatprep.subr.mxu1 %v440_v4  ;;  %3176 = vmatprep.subr.mxu0 %v442_v62 }
 0x786   :  { %v1211_v5 = vadd.f32 %v1203_v3, %v3797_v1  ;;  %v1216_v8 = vsel %vm275_vm2, %v1212_v7, 0.0  ;;  %3154 = vmatpush3.msra.mxu1 %v440_v4  ;;  %3177 = vmatpush3.msra.mxu0 %v442_v62 }
 0x787   :  { %3155 = vmatprep.subr.mxu1 %v439_v22  ;;  %3178 = vmatprep.subr.mxu0 %v441_v63 }
 0x788   :  { %v1213_v6 = vsel %vm275_vm2, %v1211_v5, 0.0  ;;  %3156 = vmatpush3.msra.mxu1 %v439_v22  ;;  %3179 = vmatpush3.msra.mxu0 %v441_v63  ;;  %v2804_v63 = vld [vmem:[%s4306_s8 + $0xd8] sm:$0xff] }
 0x789   :  { %1214 = vadd.xlane.f32.xlu0 %v1213_v6  ;;  %3157 = vmatprep.subr.mxu1 %v438_v26 }
 0x78a   :  { %3158 = vmatpush3.msra.mxu1 %v438_v26  ;;  %3205 = vmatprep.subr.mxu0 %v2804_v63 }
 0x78b   :  { %3159 = vmatprep.subr.mxu1 %v437_v28 }
 0x78c   :  { %3160 = vmatpush3.msra.mxu1 %v437_v28 }
 0x78d   :  { %1217 = vadd.xlane.f32.xlu0 %v1216_v8 }
 0x812   :  { %v1215_v9 = vpop.xlane.xlu0 %1214 }
 0x813   :  { %v1219_v10 = vmul.f32 0.03125, %v1215_v9 }
 0x815   :  { %v1221_v13 = vsub.f32 %v1211_v5, %v1219_v10 }
 0x816   :  { %v1218_v14 = vpop.xlane.xlu0 %1217 }
 0x817   :  { %v1220_v16 = vmul.f32 0.03125, %v1218_v14  ;;  %v1223_v17 = vmul.f32 %v1221_v13, %v1221_v13 }
 0x819   :  { %v1222_v18 = vsub.f32 %v1212_v7, %v1220_v16  ;;  %v1225_v19 = vsel %vm275_vm2, %v1223_v17, 0.0 }
 0x81a   :  { %1226 = vadd.xlane.f32.xlu0 %v1225_v19 }
 0x81b   :  { %v1224_v20 = vmul.f32 %v1222_v18, %v1222_v18 }
 0x81d   :  { %v1228_v1 = vsel %vm275_vm2, %v1224_v20, 0.0 }
 0x81e   :  { %1229 = vadd.xlane.f32.xlu0 %v1228_v1 }
 0x8a3   :  { %v1227_v29 = vpop.xlane.xlu0 %1226 }
 0x8a4   :  { %v1231_v30 = vmul.f32 0.03125, %v1227_v29 }
 0x8a6   :  { %v1233_v32 = vadd.f32 1e-12, %v1231_v30 }
 0x8a7   :  { %v1230_v33 = vpop.xlane.xlu0 %1229 }
 0x8a8   :  { %3365 = vrsqrt.f32 %v1233_v32  ;;  %v1232_v35 = vmul.f32 0.03125, %v1230_v33  ;;  %v1358_v32 = vsub.s32 6, %v3787_v55 }
 0x8aa   :  { %v1234_v37 = vadd.f32 1e-12, %v1232_v35  ;;  %v1359_v33 = vrot.slane %v3861_v27, %v1358_v32 }
 0x8ac   :  { %3367 = vrsqrt.f32 %v1234_v37 }
 0x8b5   :  { %v3366_v42 = vpop.eup %3365 }
 0x8b6   :  { %v1237_v43 = vmul.f32 %v3366_v42, %v1221_v13 }
 0x8b8   :  { %v1243_v47 = vmul.f32 %v1242_v40, %v1237_v43 }
 0x8b9   :  { %v3368_v48 = vpop.eup %3367 }
 0x8ba   :  { %v1238_v49 = vmul.f32 %v3368_v48, %v1222_v18  ;;  %v4011_v50 = vadd.f32 %v1248_v45, %v1243_v47 }
 0x8bc   :  { %v1244_v51 = vmul.f32 %v1242_v40, %v1238_v49  ;;  %3161 = vmatprep.mubr.msk.f32.mxu1 %vm275_vm2, %v4011_v50 }
 0x8be   :  { %v1250_v44 = vadd.f32 %v1248_v45, %v1244_v51 }
 0x8c0   :  { %3162 = vmatmul.mubr.msk.f32.vlgmr.msra.gmra.mxu1 %vm275_vm2, %v1250_v44 }
 0x980   :  { %v3163_v2 = vpop.f32.mrf.mxu1 }
 0x981   :  { %v1335_v3 = vadd.f32 %v3163_v2, %v2787_v0  ;;  %v2803_v2 = vld [vmem:[%s4306_s8 + $0xd0] sm:$0xff] }
 0x982   :  { %v1329_v5 = vpop.f32.mrf.mxu1 }
 0x983   :  { %v1341_v6 = vmul.f32 0.044715, %v1335_v3  ;;  %v1330_v7 = vadd.f32 %v2787_v0, %v1329_v5  ;;  %v1339_v28 = vmul.f32 0.5, %v1335_v3  ;;  %v2795_v0 = vld [vmem:[%s4306_s8 + $0x90] sm:$0xff]  ;;  %v2802_v5 = vld [vmem:[%s4306_s8 + $0xc8] sm:$0xff] }
 0x985   :  { %v1343_v8 = vmul.f32 %v1341_v6, %v1335_v3  ;;  %v1340_v9 = vmul.f32 0.044715, %v1330_v7  ;;  %v1338_v22 = vmul.f32 0.5, %v1330_v7  ;;  %v2793_v6 = vld [vmem:[%s4306_s8 + $0x80] sm:$0xff] }
 0x987   :  { %v1345_v10 = vmul.f32 %v1343_v8, %v1335_v3  ;;  %v1342_v13 = vmul.f32 %v1340_v9, %v1330_v7  ;;  %v2800_v8 = vld [vmem:[%s4306_s8 + $0xb8] sm:$0xff] }
 0x989   :  { %v1347_v14 = vadd.f32 %v1345_v10, %v1335_v3  ;;  %v1344_v16 = vmul.f32 %v1342_v13, %v1330_v7  ;;  %v2794_v3 = vld [vmem:[%s4306_s8 + $0x88] sm:$0xff] }
 0x98b   :  { %v1349_v17 = vmul.f32 0.7978846, %v1347_v14  ;;  %v1346_v18 = vadd.f32 %v1344_v16, %v1330_v7  ;;  %v2801_v7 = vld [vmem:[%s4306_s8 + $0xc0] sm:$0xff] }
 0x98d   :  { %3369 = vtanh.f32 %v1349_v17  ;;  %v1348_v19 = vmul.f32 0.7978846, %v1346_v18  ;;  %v1472_v18 = vsub.s32 7, %v3787_v55  ;;  %v2645_v55 = vld [vmem:[#allocation12 + $0x8] sm:$0xff] }
 0x98f   :  { %3371 = vtanh.f32 %v1348_v19  ;;  %v1473_v19 = vrot.slane %v3861_v27, %v1472_v18  ;;  %v2799_v27 = vld [vmem:[%s4306_s8 + $0xb0] sm:$0xff] }
 0x99a   :  { %v3370_v20 = vpop.eup %3369 }
 0x99b   :  { %v1353_v4 = vadd.f32 1.0, %v3370_v20 }
 0x99c   :  { %v3372_v1 = vpop.eup %3371 }
 0x99d   :  { %v1352_v26 = vadd.f32 1.0, %v3372_v1  ;;  %v1355_v30 = vmul.f32 %v1353_v4, %v1339_v28  ;;  %v2792_v4 = vld [vmem:[%s4309_s11 + $0x8] ss:$0 sm:$0xff] }
 0x99f   :  { %v1354_v29 = vmul.f32 %v1352_v26, %v1338_v22 }
 0x9a1   :  { %3180 = vmatprep.mubr.msk.f32.mxu0 %vm1360_vm7, %v1354_v29 }
 0x9a2   :  { %3181 = vmatmul.mubr.msk.f32.vlgmr.msra.gmra.mxu0 %vm1360_vm7, %v1355_v30 }
 0x9a3   :  { %3206 = vmatpush3.msra.mxu0 %v2804_v63 }
 0x9a4   :  { %3207 = vmatprep.subr.mxu0 %v2803_v2 }
 0x9a5   :  { %3208 = vmatpush3.msra.mxu0 %v2803_v2 }
 0x9a6   :  { %3209 = vmatprep.subr.mxu0 %v2802_v5 }
 0x9a7   :  { %3210 = vmatpush3.msra.mxu0 %v2802_v5 }
 0x9a8   :  { %3211 = vmatprep.subr.mxu0 %v2801_v7 }
 0x9a9   :  { %3212 = vmatpush3.msra.mxu0 %v2801_v7 }
 0x9aa   :  { %3227 = vmatprep.subr.mxu0 %v3585_v12 }
 0xa62   :  { %v3182_v35 = vpop.f32.mrf.mxu0 }
 0xa63   :  { %v1439_v40 = vadd.f32 %v3182_v35, %v1359_v33  ;;  %v2798_v35 = vld [vmem:[%s4306_s8 + $0xa8] sm:$0xff] }
 0xa64   :  { %v1433_v37 = vpop.f32.mrf.mxu0 }
 0xa65   :  { %v1434_v42 = vadd.f32 %v1433_v37, %v1359_v33  ;;  %v1443_v47 = vadd.f32 %v1439_v40, %v1250_v44  ;;  %v2796_v44 = vld [vmem:[%s4306_s8 + $0x98] sm:$0xff]  ;;  %v2797_v37 = vld [vmem:[%s4306_s8 + $0xa0] sm:$0xff]  ;;  %v4119_v40 = vld [vmem:[%s4309_s11 + $0x10] sm:$0xff] }
 0xa66   :  { %3183 = vmatprep.subr.mxu1 %v2796_v44 }
 0xa67   :  { %v1442_v43 = vadd.f32 %v1434_v42, %v4011_v50  ;;  %v1447_v48 = vsel %vm275_vm2, %v1443_v47, 0.0  ;;  %3184 = vmatpush3.msra.mxu1 %v2796_v44  ;;  %v1688_v42 = vrot.slane %v4119_v40, %v618_v34 }
 0xa68   :  { %3185 = vmatprep.subr.mxu1 %v2795_v0 }
 0xa69   :  { %v1444_v45 = vsel %vm275_vm2, %v1442_v43, 0.0  ;;  %3186 = vmatpush3.msra.mxu1 %v2795_v0 }
 0xa6a   :  { %1445 = vadd.xlane.f32.xlu0 %v1444_v45  ;;  %3187 = vmatprep.subr.mxu1 %v2794_v3 }
 0xa6b   :  { %3188 = vmatpush3.msra.mxu1 %v2794_v3 }
 0xa6c   :  { %3189 = vmatprep.subr.mxu1 %v2793_v6 }
 0xa6d   :  { %3190 = vmatpush3.msra.mxu1 %v2793_v6 }
 0xa6e   :  { %1448 = vadd.xlane.f32.xlu0 %v1447_v48  ;;  %3194 = vmatprep.subr.mxu1 %v2800_v8  ;;  %v1609_v48 = vrot.slane %v4119_v40, %v3793_v58 }
 0xaf3   :  { %v1446_v49 = vpop.xlane.xlu0 %1445 }
 0xaf4   :  { %v1450_v51 = vmul.f32 0.03125, %v1446_v49 }
 0xaf6   :  { %v1452_v52 = vsub.f32 %v1442_v43, %v1450_v51 }
 0xaf7   :  { %v1449_v53 = vpop.xlane.xlu0 %1448 }
 0xaf8   :  { %v1451_v54 = vmul.f32 0.03125, %v1449_v53  ;;  %v1454_v57 = vmul.f32 %v1452_v52, %v1452_v52 }
 0xafa   :  { %v1453_v59 = vsub.f32 %v1443_v47, %v1451_v54  ;;  %v1456_v60 = vsel %vm275_vm2, %v1454_v57, 0.0 }
 0xafb   :  { %1457 = vadd.xlane.f32.xlu0 %v1456_v60 }
 0xafc   :  { %v1455_v62 = vmul.f32 %v1453_v59, %v1453_v59 }
 0xafe   :  { %v1459_v50 = vsel %vm275_vm2, %v1455_v62, 0.0 }
 0xaff   :  { %1460 = vadd.xlane.f32.xlu0 %v1459_v50  ;;  %v1524_v50 = vrot.slane %v4119_v40, %v3790_v56 }
 0xb84   :  { %v1458_v9 = vpop.xlane.xlu0 %1457 }
 0xb85   :  { %v1462_v10 = vmul.f32 0.03125, %v1458_v9 }
 0xb87   :  { %v1464_v13 = vadd.f32 1e-12, %v1462_v10 }
 0xb88   :  { %v1461_v14 = vpop.xlane.xlu0 %1460 }
 0xb89   :  { %3373 = vrsqrt.f32 %v1464_v13  ;;  %v1463_v16 = vmul.f32 0.03125, %v1461_v14 }
 0xb8b   :  { %v1465_v17 = vadd.f32 1e-12, %v1463_v16 }
 0xb8d   :  { %3375 = vrsqrt.f32 %v1465_v17 }
 0xb96   :  { %v3374_v20 = vpop.eup %3373 }
 0xb97   :  { %v1468_v1 = vmul.f32 %v3374_v20, %v1452_v52 }
 0xb99   :  { %v1474_v22 = vmul.f32 %v1473_v19, %v1468_v1 }
 0xb9a   :  { %v3376_v26 = vpop.eup %3375 }
 0xb9b   :  { %v1469_v28 = vmul.f32 %v3376_v26, %v1453_v59  ;;  %v4086_v29 = vadd.f32 %v2792_v4, %v1474_v22 }
 0xb9d   :  { %v1475_v30 = vmul.f32 %v1473_v19, %v1469_v28  ;;  %3191 = vmatprep.mubr.msk.f32.mxu1 %vm275_vm2, %v4086_v29  ;;  %3213 = vmatprep.mubr.msk.f32.mxu0 %vm275_vm2, %v4086_v29 }
 0xb9f   :  { %v4092_v33 = vadd.f32 %v2792_v4, %v1475_v30 }
 0xba1   :  { %3192 = vmatmul.mubr.msk.f32.vlgmr.msra.gmra.mxu1 %vm275_vm2, %v4092_v33  ;;  %3214 = vmatmul.mubr.msk.f32.vlgmr.msra.gmra.mxu0 %vm275_vm2, %v4092_v33 }
 0xba2   :  { %3195 = vmatpush3.msra.mxu1 %v2800_v8  ;;  %3202 = vmatprep.mubr.msk.f32.mxu1 %vm275_vm2, %v4086_v29 }
 0xba3   :  { %3196 = vmatprep.subr.mxu1 %v2799_v27  ;;  %3235 = vmatprep.mubr.msk.f32.mxu0 %vm3586_vm3, %v3585_v12 }
 0xba4   :  { %3197 = vmatpush3.msra.mxu1 %v2799_v27 }
 0xba5   :  { %3198 = vmatprep.subr.mxu1 %v2798_v35 }
 0xba6   :  { %3199 = vmatpush3.msra.mxu1 %v2798_v35 }
 0xba7   :  { %3200 = vmatprep.subr.mxu1 %v2797_v37 }
 0xba8   :  { %3201 = vmatpush3.msra.mxu1 %v2797_v37 }
 0xba9   :  { %3203 = vmatmul.mubr.msk.f32.vlgmr.msra.gmra.mxu1 %vm275_vm2, %v4092_v33  ;;  %3216 = vmatprep.subr.mxu1 %v3585_v12 }
 0xbaa   :  { %3224 = vmatprep.mubr.msk.f32.mxu1 %vm3586_vm3, %v3585_v12 }
 0xc61   :  { %v3215_v43 = vpop.f32.mrf.mxu0  ;;  %v3193_v47 = vpop.f32.mrf.mxu1 }
 0xc62   :  { %v4124_v45 = vadd.f32 %v3215_v43, %v1688_v42  ;;  %v1603_v2 = vadd.f32 %v3193_v47, %v1524_v50  ;;  %v2805_v43 = vld [vmem:[%s4306_s8 + $0xe0] sm:$0xff] }
 0xc63   :  { %v1597_v49 = vpop.f32.mrf.mxu1  ;;  %v1755_v62 = vpop.f32.mrf.mxu0 }
 0xc64   :  { %v1756_v63 = vadd.f32 %v1755_v62, %v1688_v42  ;;  %v1598_v5 = vadd.f32 %v1597_v49, %v1524_v50  ;;  %v1778_v26 = vmul.f32 %v4124_v45, %v3870_v36  ;;  %v1777_v28 = vmul.f32 %v4124_v45, %v3880_v41 }
 0xc66   :  { %v1775_v56 = vmul.f32 %v1756_v63, %v3866_v31  ;;  %v1774_v6 = vmul.f32 %v1756_v63, %v3870_v36  ;;  %v1773_v7 = vmul.f32 %v1756_v63, %v3880_v41  ;;  %v1772_v8 = vmul.f32 %v1756_v63, %v3891_v46 }
 0xc69   :  { %v3204_v51 = vpop.f32.mrf.mxu1 }
 0xc6a   :  { %v1682_v52 = vadd.f32 %v3204_v51, %v1609_v48  ;;  %v2198_v51 = vrot.slane %v4119_v40, %v1128_v61 }
 0xc6b   :  { %v1676_v53 = vpop.f32.mrf.mxu1 }
 0xc6c   :  { %v1771_v54 = vmul.f32 %v1682_v52, %v3866_v31  ;;  %v1677_v57 = vadd.f32 %v1676_v53, %v1609_v48  ;;  %v1770_v34 = vmul.f32 %v1682_v52, %v3870_v36  ;;  %v1769_v60 = vmul.f32 %v1682_v52, %v3880_v41 }
 0xc6d   :  { %v1768_v0 = vmul.f32 %v1682_v52, %v3891_v46 }
 0xc6e   :  { %3228 = vmatpush3.xpose.msk.msra.mxu0 %vm275_vm2, %v1771_v54  ;;  %v1767_v59 = vmul.f32 %v1677_v57, %v3866_v31  ;;  %v1766_v58 = vmul.f32 %v1677_v57, %v3870_v36  ;;  %v1765_v44 = vmul.f32 %v1677_v57, %v3880_v41  ;;  %v1764_v3 = vmul.f32 %v1677_v57, %v3891_v46  ;;  %v2808_v36 = vld [vmem:[%s4306_s8 + $0xf8] sm:$0xff] }
 0xc6f   :  { %3229 = vmatprep.subr.mxu0 %v3585_v12 }
 0xc70   :  { %3217 = vmatpush3.xpose.msk.msra.mxu1 %vm275_vm2, %v1767_v59 }
 0xc71   :  { %3218 = vmatprep.subr.mxu1 %v3585_v12 }
 0xc72   :  { %3230 = vmatpush3.xpose.msk.msra.mxu0 %vm275_vm2, %v1770_v34 }
 0xc73   :  { %3231 = vmatprep.subr.mxu0 %v3585_v12 }
 0xc74   :  { %3219 = vmatpush3.xpose.msk.msra.mxu1 %vm275_vm2, %v1766_v58 }
 0xc75   :  { %3220 = vmatprep.subr.mxu1 %v3585_v12 }
 0xc76   :  { %3232 = vmatpush3.xpose.msk.msra.mxu0 %vm275_vm2, %v1769_v60 }
 0xc77   :  { %3233 = vmatprep.subr.mxu0 %v3585_v12 }
 0xc78   :  { %3221 = vmatpush3.xpose.msk.msra.mxu1 %vm275_vm2, %v1765_v44 }
 0xc79   :  { %3222 = vmatprep.subr.mxu1 %v3585_v12 }
 0xc7a   :  { %3234 = vmatpush3.xpose.msk.msra.mxu0 %vm275_vm2, %v1768_v0 }
 0xc7b   :  { %3249 = vmatprep.subr.mxu0 %v3585_v12 }
 0xc7c   :  { %3223 = vmatpush3.xpose.msk.msra.mxu1 %vm275_vm2, %v1764_v3 }
 0xc7d   :  { %3236 = vmatmul.mubr.msk.f32.vlgmr.msra.gmra.mxu0 %vm275_vm2, %v1603_v2  ;;  %3238 = vmatprep.subr.mxu1 %v3933_v21 }
 0xc7e   :  { %3250 = vmatpush3.msra.mxu0 %v1775_v56  ;;  %3257 = vmatprep.mubr.msk.f32.mxu0 %vm3586_vm3, %v3585_v12 }
 0xc7f   :  { %3251 = vmatprep.subr.mxu0 %v3585_v12  ;;  %3225 = vmatmul.mubr.msk.f32.vlgmr.msra.gmra.mxu1 %vm275_vm2, %v1598_v5  ;;  %v2811_v5 = vld [vmem:[%s4307_s9 + $0x30] sm:$0xff] }
 0xc80   :  { %3252 = vmatpush3.msra.mxu0 %v1774_v6  ;;  %3239 = vmatpush3.msra.mxu1 %v3933_v21  ;;  %v2810_v6 = vld [vmem:[%s4307_s9 + $0x28] sm:$0xff] }
 0xc81   :  { %3253 = vmatprep.subr.mxu0 %v3585_v12  ;;  %3240 = vmatprep.subr.mxu1 %v3935_v23 }
 0xc82   :  { %3254 = vmatpush3.msra.mxu0 %v1773_v7  ;;  %3241 = vmatpush3.msra.mxu1 %v3935_v23  ;;  %v2809_v7 = vld [vmem:[%s4307_s9 + $0x20] sm:$0xff] }
 0xc83   :  { %3255 = vmatprep.subr.mxu0 %v3585_v12  ;;  %3242 = vmatprep.subr.mxu1 %v3939_v24 }
 0xc84   :  { %3256 = vmatpush3.msra.mxu0 %v1772_v8  ;;  %3243 = vmatpush3.msra.mxu1 %v3939_v24 }
 0xc85   :  { %3244 = vmatprep.subr.mxu1 %v3943_v25  ;;  %3271 = vmatprep.subr.mxu0 %v2808_v36 }
 0xc86   :  { %3245 = vmatpush3.msra.mxu1 %v3943_v25 }
 0xc87   :  { %3260 = vmatprep.subr.mxu1 %v3585_v12 }
 0xd3d   :  { %v1946_v21 = vpop.f32.mrf.mxu0 }
 0xd3e   :  { %v1951_v9 = vadd.f32 %v1946_v21, %v3924_v11 }
 0xd3f   :  { %v3237_v10 = vpop.f32.mrf.mxu0  ;;  %v1861_v13 = vpop.f32.mrf.mxu1 }
 0xd40   :  { %v1955_v14 = vsel %vm275_vm2, %v1951_v9, -inf  ;;  %v1950_v23 = vadd.f32 %v1861_v13, %v3928_v15  ;;  %v1779_v15 = vmul.f32 %v4124_v45, %v3866_v31  ;;  %v1776_v31 = vmul.f32 %v4124_v45, %v3891_v46  ;;  %v2806_v46 = vld [vmem:[%s4306_s8 + $0xe8] sm:$0xff] }
 0xd41   :  { %1956 = vmax.xlane.f32.xlu0 %v1955_v14  ;;  %v3226_v16 = vpop.f32.mrf.mxu1 }
 0xd42   :  { %v1952_v17 = vsel %vm275_vm2, %v1950_v23, -inf  ;;  %v2311_v16 = vrot.slane %v4119_v40, %v1241_v38  ;;  %v2819_v38 = vld [vmem:[%s4308_s10 + $0x70] sm:$0xff] }
 0xd43   :  { %1953 = vmax.xlane.f32.xlu1 %v1952_v17 }
 0xdca   :  { %v1957_v24 = vpop.xlane.xlu0 %1956 }
 0xdcb   :  { %v1959_v19 = vsub.f32 %v1951_v9, %v1957_v24 }
 0xdcc   :  { %v1954_v20 = vpop.xlane.xlu1 %1953 }
 0xdcd   :  { %v1958_v25 = vsub.f32 %v1950_v23, %v1954_v20  ;;  %v1962_v1 = vmul.f32 1.442695, %v1959_v19 }
 0xdcf   :  { %v1960_v4 = vmul.f32 1.442695, %v1958_v25  ;;  %v2317_v25 = vrot.slane %v4119_v40, %v1247_v39  ;;  %v2818_v39 = vld [vmem:[%s4308_s10 + $0x68] sm:$0xff] }
 0xdd1   :  { %3377 = vpow2.f32 %v1960_v4 }
 0xdd2   :  { %3379 = vpow2.f32 %v1962_v1 }
 0xdde   :  { %v3378_v11 = vpop.eup %3377 }
 0xddf   :  { %v3380_v22 = vpop.eup %3379  ;;  %3246 = vmatprep.mubr.msk.f32.mxu1 %vm275_vm2, %v3378_v11 }
 0xde0   :  { %3247 = vmatmul.mubr.msk.f32.vlgmr.msra.gmra.mxu1 %vm275_vm2, %v3380_v22 }
 0xde1   :  { %3261 = vmatpush3.msra.mxu1 %v1779_v15  ;;  %3268 = vmatprep.mubr.msk.f32.mxu1 %vm3586_vm3, %v3585_v12  ;;  %v2817_v15 = vld [vmem:[%s4308_s10 + $0x60] sm:$0xff] }
 0xde2   :  { %3262 = vmatprep.subr.mxu1 %v3585_v12 }
 0xde3   :  { %3263 = vmatpush3.msra.mxu1 %v1778_v26  ;;  %v2816_v26 = vld [vmem:[%s4308_s10 + $0x58] sm:$0xff] }
 0xde4   :  { %3264 = vmatprep.subr.mxu1 %v3585_v12 }
 0xde5   :  { %3265 = vmatpush3.msra.mxu1 %v1777_v28  ;;  %v2815_v28 = vld [vmem:[%s4308_s10 + $0x50] sm:$0xff] }
 0xde6   :  { %3266 = vmatprep.subr.mxu1 %v3585_v12  ;;  %v2807_v12 = vld [vmem:[%s4306_s8 + $0xf0] sm:$0xff] }
 0xde7   :  { %3267 = vmatpush3.msra.mxu1 %v1776_v31  ;;  %v2814_v31 = vld [vmem:[%s4308_s10 + $0x48] sm:$0xff] }
 0xea0   :  { %v3248_v30 = vpop.f32.mrf.mxu1 }
 0xea1   :  { %3381 = vrcp.f32 %v3248_v30  ;;  %v2845_v30 = vld [vmem:[#allocation9 + $0x1] ss:$0 sm:$0xff] }
 0xea2   :  { %v2036_v27 = vpop.f32.mrf.mxu1 }
 0xea3   :  { %3383 = vrcp.f32 %v2036_v27 }
 0xeae   :  { %v3382_v35 = vpop.eup %3381 }
 0xeaf   :  { %v2048_v41 = vmul.f32 %v3382_v35, %v3380_v22  ;;  %v2820_v22 = vld [vmem:[%s4308_s10 + $0x78] sm:$0xff] }
 0xeb0   :  { %v3384_v37 = vpop.eup %3383 }
 0xeb1   :  { %3269 = vmatmul.mubr.msk.f32.vlgmr.msra.gmra.mxu1 %vm275_vm2, %v2048_v41  ;;  %v2047_v42 = vmul.f32 %v3384_v37, %v3378_v11 }
 0xeb3   :  { %3258 = vmatmul.mubr.msk.f32.vlgmr.msra.gmra.mxu0 %vm275_vm2, %v2047_v42 }
 0xeb4   :  { %3272 = vmatpush3.msra.mxu0 %v2808_v36  ;;  %v2813_v36 = vld [vmem:[%s4308_s10 + $0x40] sm:$0xff] }
 0xeb5   :  { %3273 = vmatprep.subr.mxu0 %v2807_v12 }
 0xeb6   :  { %3274 = vmatpush3.msra.mxu0 %v2807_v12 }
 0xeb7   :  { %3275 = vmatprep.subr.mxu0 %v2806_v46 }
 0xeb8   :  { %3276 = vmatpush3.msra.mxu0 %v2806_v46 }
 0xeb9   :  { %3277 = vmatprep.subr.mxu0 %v2805_v43 }
 0xeba   :  { %3278 = vmatpush3.msra.mxu0 %v2805_v43 }
 0xebb   :  { %3293 = vmatprep.subr.mxu0 %v2820_v22 }
 0xf71   :  { %v2191_v45 = vpop.f32.mrf.mxu1 }
 0xf73   :  { %v2118_v47 = vpop.f32.mrf.mxu0  ;;  %v3270_v48 = vpop.f32.mrf.mxu1 }
 0xf74   :  { %3279 = vmatprep.mubr.msk.f32.mxu0 %vm275_vm2, %v2118_v47 }
 0xf75   :  { %v3259_v49 = vpop.f32.mrf.mxu0  ;;  %3280 = vmatmul.mubr.msk.f32.vlgmr.msra.gmra.mxu0 %vm275_vm2, %v2191_v45 }
 0xf76   :  { %3294 = vmatpush3.msra.mxu0 %v2820_v22  ;;  %v2541_v22 = vrot.slane %v4119_v40, %v1472_v18  ;;  %v2644_v18 = vld [vmem:[#allocation12] sm:$0xff] }
 0xf77   :  { %3295 = vmatprep.subr.mxu0 %v2819_v38 }
 0xf78   :  { %3296 = vmatpush3.msra.mxu0 %v2819_v38 }
 0xf79   :  { %3297 = vmatprep.subr.mxu0 %v2818_v39 }
 0xf7a   :  { %3298 = vmatpush3.msra.mxu0 %v2818_v39 }
 0xf7b   :  { %3299 = vmatprep.subr.mxu0 %v2817_v15 }
 0xf7c   :  { %3300 = vmatpush3.msra.mxu0 %v2817_v15 }
 0xf7d   :  { %3301 = vmatprep.subr.mxu0 %v2816_v26 }
 0xf7e   :  { %3302 = vmatpush3.msra.mxu0 %v2816_v26 }
 0xf7f   :  { %3303 = vmatprep.subr.mxu0 %v2815_v28 }
 0xf80   :  { %3304 = vmatpush3.msra.mxu0 %v2815_v28  ;;  %v2850_v28 = vld [vmem:[%s4309_s11 + $0x18] ss:$0 sm:$0xff] }
 0xf81   :  { %3305 = vmatprep.subr.mxu0 %v2814_v31 }
 0xf82   :  { %3306 = vmatpush3.msra.mxu0 %v2814_v31 }
 0xf83   :  { %3307 = vmatprep.subr.mxu0 %v2813_v36 }
 0xf84   :  { %3308 = vmatpush3.msra.mxu0 %v2813_v36 }
0x1035   :  { %v3281_v52 = vpop.f32.mrf.mxu0 }
0x1036   :  { %v2277_v53 = vadd.f32 %v3281_v52, %v2198_v51 }
0x1037   :  { %v2271_v54 = vpop.f32.mrf.mxu0 }
0x1038   :  { %v2272_v57 = vadd.f32 %v2271_v54, %v2198_v51  ;;  %v2281_v59 = vadd.f32 %v2277_v53, %v4092_v33 }
0x103a   :  { %v2285_v34 = vsel %vm275_vm2, %v2281_v59, 0.0  ;;  %v2280_v58 = vadd.f32 %v2272_v57, %v4086_v29  ;;  %v2812_v29 = vld [vmem:[%s4307_s9 + $0x38] sm:$0xff] }
0x103b   :  { %2286 = vadd.xlane.f32.xlu0 %v2285_v34  ;;  %3282 = vmatprep.subr.mxu1 %v2812_v29 }
0x103c   :  { %v2282_v60 = vsel %vm275_vm2, %v2280_v58, 0.0  ;;  %3283 = vmatpush3.msra.mxu1 %v2812_v29 }
0x103d   :  { %2283 = vadd.xlane.f32.xlu1 %v2282_v60  ;;  %3284 = vmatprep.subr.mxu1 %v2811_v5 }
0x103e   :  { %3285 = vmatpush3.msra.mxu1 %v2811_v5 }
0x103f   :  { %3286 = vmatprep.subr.mxu1 %v2810_v6 }
0x1040   :  { %3287 = vmatpush3.msra.mxu1 %v2810_v6 }
0x1041   :  { %3288 = vmatprep.subr.mxu1 %v2809_v7 }
0x1042   :  { %3289 = vmatpush3.msra.mxu1 %v2809_v7 }
0x10c4   :  { %v2287_v62 = vpop.xlane.xlu0 %2286 }
0x10c5   :  { %v2289_v50 = vmul.f32 0.03125, %v2287_v62 }
0x10c6   :  { %v2284_v44 = vpop.xlane.xlu1 %2283 }
0x10c7   :  { %v2291_v63 = vsub.f32 %v2281_v59, %v2289_v50  ;;  %v2288_v0 = vmul.f32 0.03125, %v2284_v44  ;;  %v2428_v50 = vrot.slane %v4119_v40, %v1358_v32  ;;  %v2851_v40 = vld [vmem:[#allocation10] ss:$0 sm:$0xff] }
0x10c9   :  { %v2290_v61 = vsub.f32 %v2280_v58, %v2288_v0  ;;  %v2293_v2 = vmul.f32 %v2291_v63, %v2291_v63 }
0x10cb   :  { %v2297_v3 = vsel %vm275_vm2, %v2293_v2, 0.0  ;;  %v2292_v56 = vmul.f32 %v2290_v61, %v2290_v61 }
0x10cc   :  { %2298 = vadd.xlane.f32.xlu0 %v2297_v3 }
0x10cd   :  { %v2294_v33 = vsel %vm275_vm2, %v2292_v56, 0.0 }
0x10ce   :  { %2295 = vadd.xlane.f32.xlu1 %v2294_v33 }
0x1155   :  { %v2299_v8 = vpop.xlane.xlu0 %2298 }
0x1156   :  { %v2301_v21 = vmul.f32 0.03125, %v2299_v8 }
0x1157   :  { %v2296_v9 = vpop.xlane.xlu1 %2295 }
0x1158   :  { %v2303_v10 = vadd.f32 1e-12, %v2301_v21  ;;  %v2300_v13 = vmul.f32 0.03125, %v2296_v9 }
0x115a   :  { %3385 = vrsqrt.f32 %v2303_v10  ;;  %v2302_v14 = vadd.f32 1e-12, %v2300_v13 }
0x115c   :  { %3387 = vrsqrt.f32 %v2302_v14  ;;  %v2553_v14 = vld [vmem:[%s4311_s13 + $0x18] sm:$0xff] }
0x115d   :  { %3312 = vmatprep.subr.mxu1 %v2553_v14 }
0x1167   :  { %v3386_v23 = vpop.eup %3385 }
0x1168   :  { %v2307_v17 = vmul.f32 %v3386_v23, %v2291_v63  ;;  %v2552_v23 = vld [vmem:[%s4311_s13 + $0x10] sm:$0xff] }
0x1169   :  { %v3388_v24 = vpop.eup %3387 }
0x116a   :  { %v2306_v19 = vmul.f32 %v3388_v24, %v2290_v61  ;;  %v2313_v20 = vmul.f32 %v2311_v16, %v2307_v17  ;;  %v2550_v17 = vld [vmem:[%s4311_s13] sm:$0xff] }
0x116c   :  { %v2312_v1 = vmul.f32 %v2311_v16, %v2306_v19  ;;  %v2319_v11 = vadd.f32 %v2317_v25, %v2313_v20  ;;  %v2551_v16 = vld [vmem:[%s4311_s13 + $0x8] sm:$0xff] }
0x116e   :  { %v2318_v4 = vadd.f32 %v2317_v25, %v2312_v1 }
0x1170   :  { %3290 = vmatprep.mubr.msk.f32.mxu1 %vm275_vm2, %v2318_v4 }
0x1171   :  { %3291 = vmatmul.mubr.msk.f32.vlgmr.msra.gmra.mxu1 %vm275_vm2, %v2319_v11 }
0x1172   :  { %3313 = vmatpush3.msra.mxu1 %v2553_v14 }
0x1173   :  { %3314 = vmatprep.subr.mxu1 %v2552_v23 }
0x1174   :  { %3315 = vmatpush3.msra.mxu1 %v2552_v23 }
0x1175   :  { %3316 = vmatprep.subr.mxu1 %v2551_v16 }
0x1176   :  { %3317 = vmatpush3.msra.mxu1 %v2551_v16 }
0x1177   :  { %3318 = vmatprep.subr.mxu1 %v2550_v17 }
0x1178   :  { %3319 = vmatpush3.msra.mxu1 %v2550_v17 }
0x1231   :  { %v3292_v27 = vpop.f32.mrf.mxu1 }
0x1232   :  { %v2404_v35 = vadd.f32 %v3292_v27, %v2845_v30  ;;  %v2647_v27 = vld [vmem:[#allocation12 + $0x18] sm:$0xff] }
0x1233   :  { %v2398_v41 = vpop.f32.mrf.mxu1  ;;  %3323 = vmatprep.subr.mxu1 %v2647_v27 }
0x1234   :  { %v2410_v37 = vmul.f32 0.044715, %v2404_v35  ;;  %v2399_v42 = vadd.f32 %v2845_v30, %v2398_v41  ;;  %v2408_v58 = vmul.f32 0.5, %v2404_v35 }
0x1236   :  { %v2412_v12 = vmul.f32 %v2410_v37, %v2404_v35  ;;  %v2409_v46 = vmul.f32 0.044715, %v2399_v42  ;;  %v2407_v59 = vmul.f32 0.5, %v2399_v42 }
0x1238   :  { %v2414_v43 = vmul.f32 %v2412_v12, %v2404_v35  ;;  %v2411_v45 = vmul.f32 %v2409_v46, %v2399_v42 }
0x123a   :  { %v2416_v47 = vadd.f32 %v2414_v43, %v2404_v35  ;;  %v2413_v48 = vmul.f32 %v2411_v45, %v2399_v42  ;;  %v2646_v35 = vld [vmem:[#allocation12 + $0x10] sm:$0xff]  ;;  %v2854_v45 = vld [vmem:[#allocation13] ss:$0 sm:$0xff] }
0x123c   :  { %v2418_v49 = vmul.f32 0.7978846, %v2416_v47  ;;  %v2415_v51 = vadd.f32 %v2413_v48, %v2399_v42 }
0x123e   :  { %3389 = vtanh.f32 %v2418_v49  ;;  %v2417_v52 = vmul.f32 0.7978846, %v2415_v51 }
0x1240   :  { %3391 = vtanh.f32 %v2417_v52 }
0x124b   :  { %v3390_v53 = vpop.eup %3389 }
0x124c   :  { %v2422_v57 = vadd.f32 1.0, %v3390_v53 }
0x124d   :  { %v3392_v54 = vpop.eup %3391 }
0x124e   :  { %v2421_v34 = vadd.f32 1.0, %v3392_v54  ;;  %v2424_v62 = vmul.f32 %v2422_v57, %v2408_v58 }
0x1250   :  { %v2423_v60 = vmul.f32 %v2421_v34, %v2407_v59 }
0x1252   :  { %3309 = vmatprep.mubr.msk.f32.mxu0 %vm1360_vm7, %v2423_v60 }
0x1253   :  { %3310 = vmatmul.mubr.msk.f32.vlgmr.msra.gmra.mxu0 %vm1360_vm7, %v2424_v62 }
0x1313   :  { %v3311_v44 = vpop.f32.mrf.mxu0 }
0x1314   :  { %v2507_v63 = vadd.f32 %v3311_v44, %v2428_v50 }
0x1315   :  { %v2501_v0 = vpop.f32.mrf.mxu0 }
0x1316   :  { %v2502_v61 = vadd.f32 %v2501_v0, %v2428_v50  ;;  %v2511_v2 = vadd.f32 %v2507_v63, %v2319_v11 }
0x1318   :  { %v2515_v3 = vsel %vm275_vm2, %v2511_v2, 0.0  ;;  %v2510_v56 = vadd.f32 %v2502_v61, %v2318_v4 }
0x1319   :  { %2516 = vadd.xlane.f32.xlu0 %v2515_v3 }
0x131a   :  { %v2512_v33 = vsel %vm275_vm2, %v2510_v56, 0.0 }
0x131b   :  { %2513 = vadd.xlane.f32.xlu1 %v2512_v33 }
0x13a2   :  { %v2517_v29 = vpop.xlane.xlu0 %2516 }
0x13a3   :  { %v2519_v5 = vmul.f32 0.03125, %v2517_v29 }
0x13a4   :  { %v2514_v6 = vpop.xlane.xlu1 %2513 }
0x13a5   :  { %v2521_v7 = vsub.f32 %v2511_v2, %v2519_v5  ;;  %v2518_v8 = vmul.f32 0.03125, %v2514_v6 }
0x13a7   :  { %v2520_v21 = vsub.f32 %v2510_v56, %v2518_v8  ;;  %v2523_v9 = vmul.f32 %v2521_v7, %v2521_v7 }
0x13a9   :  { %v2527_v32 = vsel %vm275_vm2, %v2523_v9, 0.0  ;;  %v2522_v10 = vmul.f32 %v2520_v21, %v2520_v21 }
0x13aa   :  { %2528 = vadd.xlane.f32.xlu0 %v2527_v32 }
0x13ab   :  { %v2524_v13 = vsel %vm275_vm2, %v2522_v10, 0.0 }
0x13ac   :  { %2525 = vadd.xlane.f32.xlu1 %v2524_v13 }
0x1433   :  { %v2529_v24 = vpop.xlane.xlu0 %2528 }
0x1434   :  { %v2531_v19 = vmul.f32 0.03125, %v2529_v24 }
0x1435   :  { %v2526_v20 = vpop.xlane.xlu1 %2525 }
0x1436   :  { %v2533_v25 = vadd.f32 1e-12, %v2531_v19  ;;  %v2530_v1 = vmul.f32 0.03125, %v2526_v20 }
0x1438   :  { %3393 = vrsqrt.f32 %v2533_v25  ;;  %v2532_v4 = vadd.f32 1e-12, %v2530_v1 }
0x143a   :  { %3395 = vrsqrt.f32 %v2532_v4 }
0x1445   :  { %v3394_v11 = vpop.eup %3393 }
0x1446   :  { %v2537_v38 = vmul.f32 %v3394_v11, %v2521_v7 }
0x1447   :  { %v3396_v39 = vpop.eup %3395 }
0x1448   :  { %v2536_v15 = vmul.f32 %v3396_v39, %v2520_v21  ;;  %v2543_v26 = vmul.f32 %v2541_v22, %v2537_v38 }
0x144a   :  { %v2542_v31 = vmul.f32 %v2541_v22, %v2536_v15  ;;  %v2549_v30 = vadd.f32 %v2850_v28, %v2543_v26 }
0x144c   :  { %v2548_v36 = vadd.f32 %v2850_v28, %v2542_v31 }
0x144e   :  { %3320 = vmatprep.mubr.msk.f32.mxu1 %vm275_vm2, %v2548_v36 }
0x144f   :  { %3321 = vmatmul.mubr.msk.f32.vlgmr.msra.gmra.mxu1 %vm275_vm2, %v2549_v30 }
0x1450   :  { %3324 = vmatpush3.msra.mxu1 %v2647_v27 }
0x1451   :  { %3325 = vmatprep.subr.mxu1 %v2646_v35 }
0x1452   :  { %3326 = vmatpush3.msra.mxu1 %v2646_v35 }
0x1453   :  { %3327 = vmatprep.subr.mxu1 %v2645_v55 }
0x1454   :  { %3328 = vmatpush3.msra.mxu1 %v2645_v55 }
0x1455   :  { %3329 = vmatprep.subr.mxu1 %v2644_v18 }
0x1456   :  { %3330 = vmatpush3.msra.mxu1 %v2644_v18 }
0x150f   :  { %v3322_v41 = vpop.f32.mrf.mxu1 }
0x1510   :  { %v2639_v37 = vadd.f32 %v3322_v41, %v2851_v40 }
0x1511   :  { %v2633_v42 = vpop.f32.mrf.mxu1 }
0x1512   :  { %v2634_v12 = vadd.f32 %v2851_v40, %v2633_v42 }
0x1514   :  { %3397 = vtanh.f32 %v2634_v12 }
0x1515   :  { %3399 = vtanh.f32 %v2639_v37 }
0x1521   :  { %v3398_v46 = vpop.eup %3397 }
0x1522   :  { %v3400_v43 = vpop.eup %3399  ;;  %3331 = vmatprep.mubr.msk.f32.mxu1 %vm275_vm2, %v3398_v46 }
0x1523   :  { %3332 = vmatmul.mubr.msk.f32.vlgmr.msra.gmra.mxu1 %vm275_vm2, %v3400_v43 }
0x15e3   :  { %v3333_v47 = vpop.f32.mrf.mxu1 }
0x15e4   :  { %v2733_v48 = vadd.f32 %v3333_v47, %v2854_v45 }
0x15e5   :  { %v2727_v49 = vpop.f32.mrf.mxu1 }
0x15e6   :  { %2737 = vst [vmem:[%s4315_s17 + $0x8] sm:$0xff] %v2733_v48  ;;  %v2728_v51 = vadd.f32 %v2854_v45, %v2727_v49 }
0x15e8   :  { %2736 = vst [vmem:[%s4315_s17] sm:$0xff] %v2728_v51 }
0x15e9   :  { %2742 = vsyncpa [#allocation3], 1 }
0x15ea   :  { %2743 = vsyncpa [#allocation5], 1 }
0x15eb   :  { %2744 = vsyncpa [#allocation8], 1 }
0x15ec   :  { %2745 = vsyncpa [#allocation11], 1 }
0x15ed   :  { %2746 = vsyncpa [#allocation14], 1 }

</bundles_post_ra>
